<compile_context>
chip_gen: v6e
topology: v6e:2x2x1
jax: 0.10.0
libtpu: 0.0.40
codegen_flags: <defaults>
</compile_context>

<pallas_src>
import functools
import numpy as np
import jax
import jax.numpy as jnp
from jax.experimental import pallas as pl
from jax.experimental.pallas import tpu as pltpu


def _layer_norm(t, gamma, beta, eps=1e-5):
    mu = jnp.mean(t, axis=-1, keepdims=True)
    d = t - mu
    var = jnp.mean(d * d, axis=-1, keepdims=True)
    return d * jax.lax.rsqrt(var + eps) * gamma + beta


def decoder_layer_kernel(xq_ref, xkv_ref, bias_ref,
                         wq_ref, bq_ref, wk_ref, bk_ref, wv_ref, bv_ref,
                         wo_ref, bo_ref, g1_ref, be1_ref,
                         w1_ref, b1_ref, w2_ref, b2_ref, g2_ref, be2_ref,
                         out_ref, attn_ref,
                         k_scr, v_scr, ctx_scr,
                         *, n_heads, d_k):
    bf16 = jnp.bfloat16
    f32 = jnp.float32
    qi = pl.program_id(1)

    # --- K/V projections: once per batch element, cached in VMEM scratch ----
    @pl.when(qi == 0)
    def _():
        x_kv = xkv_ref[0]                                   # (S, D) bf16
        k = jnp.dot(x_kv, wk_ref[...], preferred_element_type=f32) + bk_ref[...]
        v = jnp.dot(x_kv, wv_ref[...], preferred_element_type=f32) + bv_ref[...]
        k_bf = k.astype(bf16)
        v_bf = v.astype(bf16)
        # d_k-aligned lane slices (cheap when d_k is a multiple of 128).
        for h in range(n_heads):
            k_scr[h] = k_bf[:, h * d_k:(h + 1) * d_k]
            v_scr[h] = v_bf[:, h * d_k:(h + 1) * d_k]

    # --- Q projection for this q-tile (1/sqrt(d_k) already folded into Wq) --
    x_q = xq_ref[0]                                         # (TQ, D) f32
    q = jnp.dot(x_q.astype(bf16), wq_ref[...], preferred_element_type=f32) + bq_ref[...]
    q_bf = q.astype(bf16)
    q3 = jnp.stack([q_bf[:, h * d_k:(h + 1) * d_k] for h in range(n_heads)], axis=0)

    # --- attention scores: batched QK^T on the MXU + additive mask bias -----
    scores = jnp.einsum('hqd,hkd->hqk', q3, k_scr[...],
                        preferred_element_type=f32)         # (H, TQ, S) f32
    scores = scores + bias_ref[0].astype(f32)[None, :, :]

    m = jnp.max(scores, axis=-1, keepdims=True)
    e = jnp.exp(scores - m)
    denom = jnp.sum(e, axis=-1, keepdims=True)
    p = e * pl.reciprocal(denom, approx=True)               # (H, TQ, S) f32
    p_bf = p.astype(bf16)
    attn_ref[0] = p_bf                                      # bf16 writeback

    # --- attn @ V, then a single concatenated-head output projection --------
    ctx = jnp.einsum('hqk,hkd->hqd', p_bf, v_scr[...],
                     preferred_element_type=f32)            # (H, TQ, d_k) f32
    for h in range(n_heads):
        ctx_scr[:, h * d_k:(h + 1) * d_k] = ctx[h].astype(bf16)
    attn_out = jnp.dot(ctx_scr[...], wo_ref[...],
                       preferred_element_type=f32) + bo_ref[...]

    # --- residual + LayerNorm 1 ---------------------------------------------
    y = _layer_norm(attn_out + x_q, g1_ref[...], be1_ref[...])

    # --- position-wise FFN (Conv1d k=1 == Linear) + ReLU ---------------------
    h1 = jnp.dot(y.astype(bf16), w1_ref[...], preferred_element_type=f32) + b1_ref[...]
    h1 = jnp.maximum(h1, 0.0)
    f = jnp.dot(h1.astype(bf16), w2_ref[...], preferred_element_type=f32) + b2_ref[...]

    # --- residual + LayerNorm 2 ---------------------------------------------
    out_ref[0] = _layer_norm(f + y, g2_ref[...], be2_ref[...])


def decoder_layer(x, mask, params, *, n_heads, q_tile=None):
    """x: (B, S, D) f32, mask: (B, S, S) int (1 = masked).
    Returns (dec_outputs f32, dec_self_attn bf16)."""
    B, S, D = x.shape
    assert D % n_heads == 0
    d_k = D // n_heads
    F = params["w1"].shape[1]

    # Per-generation knob: 256 works well on v5e/v6e (128 MiB VMEM); keep
    # <=128 on v7x (64 MiB VMEM).
    if q_tile is None:
        q_tile = S if S <= 128 else 128
    assert S % q_tile == 0 and (q_tile == S or q_tile % 8 == 0)
    n_q = S // q_tile

    bf16 = jnp.bfloat16
    scale = np.float32(1.0 / np.sqrt(d_k))
    # Fold the 1/sqrt(d_k) scale into Wq/bq in f32, then cast weights to bf16.
    wq = (params["wq"] * scale).astype(bf16)
    bq = params["bq"] * scale
    wk = params["wk"].astype(bf16)
    wv = params["wv"].astype(bf16)
    wo = params["wo"].astype(bf16)
    w1 = params["w1"].astype(bf16)
    w2 = params["w2"].astype(bf16)

    x_kv = x.astype(bf16)                               # bf16 K/V source (half DMA)
    # Additive mask bias (0 / -1e9) shipped in bf16 instead of an int32 mask.
    bias = jnp.where(mask != 0, jnp.float32(-1e9), jnp.float32(0.0)).astype(bf16)

    kern = functools.partial(decoder_layer_kernel, n_heads=n_heads, d_k=d_k)

    # Constant-index specs for weights/biases (fetched once, reused).
    rep = lambda shape: pl.BlockSpec(shape, lambda b, qi, _s=shape: (0,) * len(_s))

    grid_spec = pltpu.PrefetchScalarGridSpec(
        num_scalar_prefetch=0,
        grid=(B, n_q),
        in_specs=[
            pl.BlockSpec((1, q_tile, D), lambda b, qi: (b, qi, 0)),   # x query tile (f32)
            pl.BlockSpec((1, S, D), lambda b, qi: (b, 0, 0)),         # x full seq (bf16)
            pl.BlockSpec((1, q_tile, S), lambda b, qi: (b, qi, 0)),   # mask bias (bf16)
            rep((D, D)), rep((1, D)),            # Wq (pre-scaled), bq (pre-scaled)
            rep((D, D)), rep((1, D)),            # Wk, bk
            rep((D, D)), rep((1, D)),            # Wv, bv
            rep((D, D)), rep((1, D)),            # Wo, bo
            rep((1, D)), rep((1, D)),            # LN1 gamma, beta
            rep((D, F)), rep((1, F)),            # W1, b1
            rep((F, D)), rep((1, D)),            # W2, b2
            rep((1, D)), rep((1, D)),            # LN2 gamma, beta
        ],
        out_specs=[
            pl.BlockSpec((1, q_tile, D), lambda b, qi: (b, qi, 0)),
            pl.BlockSpec((1, n_heads, q_tile, S), lambda b, qi: (b, 0, qi, 0)),
        ],
        scratch_shapes=[
            pltpu.VMEM((n_heads, S, d_k), bf16),    # K cache (head-major)
            pltpu.VMEM((n_heads, S, d_k), bf16),    # V cache (head-major)
            pltpu.VMEM((q_tile, D), bf16),          # concatenated-head context
        ],
    )

    out_shapes = (
        jax.ShapeDtypeStruct((B, S, D), jnp.float32),
        jax.ShapeDtypeStruct((B, n_heads, S, S), jnp.bfloat16),
    )

    # Explicit VMEM budget: double-buffered input/output blocks + scratch,
    # with 2x headroom; never below 32 MiB (>= default scoped limit), capped
    # at 64 MiB (v7x physical VMEM).
    est = 2 * (q_tile * D * 4 + S * D * 2 + q_tile * S * 2
               + 4 * D * D * 2 + D * F * 2 + F * D * 2
               + 8 * D * 4 + F * 4 + D * 4
               + q_tile * D * 4 + n_heads * q_tile * S * 2) \
        + 2 * n_heads * S * d_k * 2 + q_tile * D * 2
    vmem_limit = int(min(max(2 * est, 32 << 20), 64 << 20))

    return pl.pallas_call(
        kern,
        out_shape=out_shapes,
        grid_spec=grid_spec,
        compiler_params=pltpu.CompilerParams(
            dimension_semantics=("parallel", "arbitrary"),
            vmem_limit_bytes=vmem_limit),
    )(x, x_kv, bias,
      wq, bq, wk, params["bk"], wv, params["bv"],
      wo, params["bo"], params["g1"], params["be1"],
      w1, params["b1"], w2, params["b2"], params["g2"], params["be2"])


def reference(x, mask, params, *, n_heads, compute_dtype=jnp.float32):
    """Pure-JAX reference.  compute_dtype=bf16 mirrors the kernel's mixed
    precision (bf16 matmul operands, f32 accumulation); f32 is the exact
    semantics of the original fp32 PyTorch module."""
    B, S, D = x.shape
    d_k = D // n_heads
    c = lambda t: t.astype(compute_dtype)
    mm = lambda a, b: jnp.dot(c(a), c(b), preferred_element_type=jnp.float32)

    q = mm(x, params["wq"]) + params["bq"]
    q = q * (1.0 / np.sqrt(d_k))
    k = mm(x, params["wk"]) + params["bk"]
    v = mm(x, params["wv"]) + params["bv"]
    rs = lambda t: t.reshape(B, S, n_heads, d_k).transpose(0, 2, 1, 3)
    qh, kh, vh = rs(q), rs(k), rs(v)
    scores = jnp.einsum("bhqd,bhkd->bhqk", c(qh), c(kh),
                        preferred_element_type=jnp.float32)
    scores = jnp.where(mask[:, None, :, :] != 0, -1e9, scores)
    attn = jax.nn.softmax(scores, axis=-1)
    ctx = jnp.einsum("bhqk,bhkd->bhqd", c(attn), c(vh),
                     preferred_element_type=jnp.float32)
    ctx = ctx.transpose(0, 2, 1, 3).reshape(B, S, D)
    ao = mm(ctx, params["wo"]) + params["bo"]
    ln = lambda t, g, b: ((t - t.mean(-1, keepdims=True))
                          * jax.lax.rsqrt(t.var(-1, keepdims=True) + 1e-5) * g + b)
    y = ln(ao + x, params["g1"], params["be1"])
    h1 = jnp.maximum(mm(y, params["w1"]) + params["b1"], 0.0)
    f = mm(h1, params["w2"]) + params["b2"]
    z = ln(f + y, params["g2"], params["be2"])
    return z, attn


if __name__ == "__main__":
    # Small but layout-friendly shapes: d_k = 256/2 = 128 lanes per head,
    # S=16 with q_tile=8 exercises the (batch, query-tile) grid = (2, 2)
    # including the K/V-scratch reuse across q-tiles.
    B, S, D, H, F = 2, 16, 256, 2, 512
    Q_TILE = 8
    key = jax.random.PRNGKey(0)
    ks = jax.random.split(key, 16)
    sc = 0.05

    params = dict(
        wq=sc * jax.random.normal(ks[0], (D, D), jnp.float32),
        bq=sc * jax.random.normal(ks[1], (1, D), jnp.float32),
        wk=sc * jax.random.normal(ks[2], (D, D), jnp.float32),
        bk=sc * jax.random.normal(ks[3], (1, D), jnp.float32),
        wv=sc * jax.random.normal(ks[4], (D, D), jnp.float32),
        bv=sc * jax.random.normal(ks[5], (1, D), jnp.float32),
        wo=sc * jax.random.normal(ks[6], (D, D), jnp.float32),
        bo=sc * jax.random.normal(ks[7], (1, D), jnp.float32),
        g1=jnp.ones((1, D), jnp.float32),
        be1=jnp.zeros((1, D), jnp.float32),
        w1=sc * jax.random.normal(ks[8], (D, F), jnp.float32),
        b1=sc * jax.random.normal(ks[9], (1, F), jnp.float32),
        w2=sc * jax.random.normal(ks[10], (F, D), jnp.float32),
        b2=sc * jax.random.normal(ks[11], (1, D), jnp.float32),
        g2=jnp.ones((1, D), jnp.float32),
        be2=jnp.zeros((1, D), jnp.float32),
    )

    x = jax.random.normal(ks[12], (B, S, D), jnp.float32)
    # causal (subsequent) mask: 1 above the diagonal = masked (as masked_fill_)
    causal = jnp.triu(jnp.ones((S, S), jnp.int32), k=1)
    mask = jnp.broadcast_to(causal, (B, S, S))

    out, attn = decoder_layer(x, mask, params, n_heads=H, q_tile=Q_TILE)
    jax.block_until_ready((out, attn))

    # Tight check against a reference using the same bf16-operand /
    # f32-accumulate policy as the kernel.
    ref_out, ref_attn = reference(x, mask, params, n_heads=H,
                                  compute_dtype=jnp.bfloat16)
    assert jnp.allclose(out, ref_out, rtol=2e-2, atol=2e-2)
    assert jnp.allclose(attn.astype(jnp.float32), ref_attn, rtol=2e-2, atol=2e-2)

    # Looser check against the exact fp32 semantics of the original module
    # (difference is only the intended bf16 mixed precision).
    ref_out32, ref_attn32 = reference(x, mask, params, n_heads=H,
                                      compute_dtype=jnp.float32)
    assert jnp.allclose(out, ref_out32, rtol=1e-1, atol=1e-1)
    assert jnp.allclose(attn.astype(jnp.float32), ref_attn32, rtol=5e-2, atol=5e-2)

    print("KERNEL_OK")
</pallas_src>

<mosaic_0001>
module attributes {stable_mosaic.version = 11 : i64} {
  func.func @decoder_layer_kernel(%arg0: i32, %arg1: i32, %arg2: memref<1x8x256xf32, #tpu.memory_space<vmem>>, %arg3: memref<1x16x256xbf16, #tpu.memory_space<vmem>>, %arg4: memref<1x8x16xbf16, #tpu.memory_space<vmem>>, %arg5: memref<256x256xbf16, #tpu.memory_space<vmem>>, %arg6: memref<1x256xf32, #tpu.memory_space<vmem>>, %arg7: memref<256x256xbf16, #tpu.memory_space<vmem>>, %arg8: memref<1x256xf32, #tpu.memory_space<vmem>>, %arg9: memref<256x256xbf16, #tpu.memory_space<vmem>>, %arg10: memref<1x256xf32, #tpu.memory_space<vmem>>, %arg11: memref<256x256xbf16, #tpu.memory_space<vmem>>, %arg12: memref<1x256xf32, #tpu.memory_space<vmem>>, %arg13: memref<1x256xf32, #tpu.memory_space<vmem>>, %arg14: memref<1x256xf32, #tpu.memory_space<vmem>>, %arg15: memref<256x512xbf16, #tpu.memory_space<vmem>>, %arg16: memref<1x512xf32, #tpu.memory_space<vmem>>, %arg17: memref<512x256xbf16, #tpu.memory_space<vmem>>, %arg18: memref<1x256xf32, #tpu.memory_space<vmem>>, %arg19: memref<1x256xf32, #tpu.memory_space<vmem>>, %arg20: memref<1x256xf32, #tpu.memory_space<vmem>>, %arg21: memref<1x8x256xf32, #tpu.memory_space<vmem>>, %arg22: memref<1x2x8x16xbf16, #tpu.memory_space<vmem>>, %arg23: memref<2x16x128xbf16, #tpu.memory_space<vmem>>, %arg24: memref<2x16x128xbf16, #tpu.memory_space<vmem>>, %arg25: memref<8x256xbf16, #tpu.memory_space<vmem>>) attributes {dimension_semantics = [#tpu.dimension_semantics<parallel>, #tpu.dimension_semantics<arbitrary>], iteration_bounds = array<i64: 2, 2>, scalar_prefetch = 0 : i64, scratch_operands = 3 : i64, tpu.core_type = #tpu.core_type<tc>, window_params = [{transform_indices = @transform_0, window_bounds = array<i64: 1, 8, 256>}, {transform_indices = @transform_1, window_bounds = array<i64: 1, 16, 256>}, {transform_indices = @transform_2, window_bounds = array<i64: 1, 8, 16>}, {pipeline_mode = #tpu.pipeline_mode<synchronous>, transform_indices = @transform_3, window_bounds = array<i64: 256, 256>}, {pipeline_mode = #tpu.pipeline_mode<synchronous>, transform_indices = @transform_4, window_bounds = array<i64: 1, 256>}, {pipeline_mode = #tpu.pipeline_mode<synchronous>, transform_indices = @transform_5, window_bounds = array<i64: 256, 256>}, {pipeline_mode = #tpu.pipeline_mode<synchronous>, transform_indices = @transform_6, window_bounds = array<i64: 1, 256>}, {pipeline_mode = #tpu.pipeline_mode<synchronous>, transform_indices = @transform_7, window_bounds = array<i64: 256, 256>}, {pipeline_mode = #tpu.pipeline_mode<synchronous>, transform_indices = @transform_8, window_bounds = array<i64: 1, 256>}, {pipeline_mode = #tpu.pipeline_mode<synchronous>, transform_indices = @transform_9, window_bounds = array<i64: 256, 256>}, {pipeline_mode = #tpu.pipeline_mode<synchronous>, transform_indices = @transform_10, window_bounds = array<i64: 1, 256>}, {pipeline_mode = #tpu.pipeline_mode<synchronous>, transform_indices = @transform_11, window_bounds = array<i64: 1, 256>}, {pipeline_mode = #tpu.pipeline_mode<synchronous>, transform_indices = @transform_12, window_bounds = array<i64: 1, 256>}, {pipeline_mode = #tpu.pipeline_mode<synchronous>, transform_indices = @transform_13, window_bounds = array<i64: 256, 512>}, {pipeline_mode = #tpu.pipeline_mode<synchronous>, transform_indices = @transform_14, window_bounds = array<i64: 1, 512>}, {pipeline_mode = #tpu.pipeline_mode<synchronous>, transform_indices = @transform_15, window_bounds = array<i64: 512, 256>}, {pipeline_mode = #tpu.pipeline_mode<synchronous>, transform_indices = @transform_16, window_bounds = array<i64: 1, 256>}, {pipeline_mode = #tpu.pipeline_mode<synchronous>, transform_indices = @transform_17, window_bounds = array<i64: 1, 256>}, {pipeline_mode = #tpu.pipeline_mode<synchronous>, transform_indices = @transform_18, window_bounds = array<i64: 1, 256>}, {transform_indices = @transform_19, window_bounds = array<i64: 1, 8, 256>}, {transform_indices = @transform_20, window_bounds = array<i64: 1, 2, 8, 16>}]} {
    %c0_i32 = arith.constant 0 : i32
    %0 = arith.cmpi eq, %arg1, %c0_i32 : i32
    %1 = arith.extui %0 : i1 to i32
    %c0_i32_0 = arith.constant 0 : i32
    %2 = arith.cmpi ne, %1, %c0_i32_0 : i32
    scf.if %2 {
      %c0_66 = arith.constant 0 : index
      %c0_67 = arith.constant 0 : index
      %c0_68 = arith.constant 0 : index
      %118 = vector.load %arg3[%c0_66, %c0_67, %c0_68] : memref<1x16x256xbf16, #tpu.memory_space<vmem>>, vector<1x16x256xbf16>
      %119 = vector.shape_cast %118 : vector<1x16x256xbf16> to vector<16x256xbf16>
      %c0_69 = arith.constant 0 : index
      %c0_70 = arith.constant 0 : index
      %120 = vector.load %arg7[%c0_69, %c0_70] : memref<256x256xbf16, #tpu.memory_space<vmem>>, vector<256x256xbf16>
      %cst_71 = arith.constant dense<0.000000e+00> : vector<16x256xf32>
      %121 = tpu.matmul %119, %120, %cst_71 {dimension_numbers = #tpu.dot_dimension_numbers<[1], [0], [0], [1], [0, 0, 1, 1], [], []>} : vector<16x256xbf16>, vector<256x256xbf16>, vector<16x256xf32> -> vector<16x256xf32>
      %c0_72 = arith.constant 0 : index
      %c0_73 = arith.constant 0 : index
      %122 = vector.load %arg8[%c0_72, %c0_73] : memref<1x256xf32, #tpu.memory_space<vmem>>, vector<1x256xf32>
      %123 = vector.broadcast %122 : vector<1x256xf32> to vector<16x256xf32>
      %124 = arith.addf %121, %123 : vector<16x256xf32>
      %c0_74 = arith.constant 0 : index
      %c0_75 = arith.constant 0 : index
      %125 = vector.load %arg9[%c0_74, %c0_75] : memref<256x256xbf16, #tpu.memory_space<vmem>>, vector<256x256xbf16>
      %cst_76 = arith.constant dense<0.000000e+00> : vector<16x256xf32>
      %126 = tpu.matmul %119, %125, %cst_76 {dimension_numbers = #tpu.dot_dimension_numbers<[1], [0], [0], [1], [0, 0, 1, 1], [], []>} : vector<16x256xbf16>, vector<256x256xbf16>, vector<16x256xf32> -> vector<16x256xf32>
      %c0_77 = arith.constant 0 : index
      %c0_78 = arith.constant 0 : index
      %127 = vector.load %arg10[%c0_77, %c0_78] : memref<1x256xf32, #tpu.memory_space<vmem>>, vector<1x256xf32>
      %128 = vector.broadcast %127 : vector<1x256xf32> to vector<16x256xf32>
      %129 = arith.addf %126, %128 : vector<16x256xf32>
      %130 = arith.truncf %124 : vector<16x256xf32> to vector<16x256xbf16>
      %131 = arith.truncf %129 : vector<16x256xf32> to vector<16x256xbf16>
      %132 = vector.extract_strided_slice %130 {offsets = [0, 0], sizes = [16, 128], strides = [1, 1]} : vector<16x256xbf16> to vector<16x128xbf16>
      %c0_79 = arith.constant 0 : index
      %c0_80 = arith.constant 0 : index
      %c0_81 = arith.constant 0 : index
      %133 = vector.load %arg23[%c0_79, %c0_80, %c0_81] : memref<2x16x128xbf16, #tpu.memory_space<vmem>>, vector<1x16x128xbf16>
      %134 = vector.shape_cast %133 : vector<1x16x128xbf16> to vector<16x128xbf16>
      %135 = vector.shape_cast %132 : vector<16x128xbf16> to vector<1x16x128xbf16>
      tpu.vector_store %arg23[%c0_79, %c0_80, %c0_81], %135 {strides = array<i32>} : memref<2x16x128xbf16, #tpu.memory_space<vmem>>, vector<1x16x128xbf16>,
      %136 = vector.extract_strided_slice %131 {offsets = [0, 0], sizes = [16, 128], strides = [1, 1]} : vector<16x256xbf16> to vector<16x128xbf16>
      %c0_82 = arith.constant 0 : index
      %c0_83 = arith.constant 0 : index
      %c0_84 = arith.constant 0 : index
      %137 = vector.load %arg24[%c0_82, %c0_83, %c0_84] : memref<2x16x128xbf16, #tpu.memory_space<vmem>>, vector<1x16x128xbf16>
      %138 = vector.shape_cast %137 : vector<1x16x128xbf16> to vector<16x128xbf16>
      %139 = vector.shape_cast %136 : vector<16x128xbf16> to vector<1x16x128xbf16>
      tpu.vector_store %arg24[%c0_82, %c0_83, %c0_84], %139 {strides = array<i32>} : memref<2x16x128xbf16, #tpu.memory_space<vmem>>, vector<1x16x128xbf16>,
      %140 = vector.extract_strided_slice %130 {offsets = [0, 128], sizes = [16, 128], strides = [1, 1]} : vector<16x256xbf16> to vector<16x128xbf16>
      %c1 = arith.constant 1 : index
      %c0_85 = arith.constant 0 : index
      %c0_86 = arith.constant 0 : index
      %141 = vector.load %arg23[%c1, %c0_85, %c0_86] : memref<2x16x128xbf16, #tpu.memory_space<vmem>>, vector<1x16x128xbf16>
      %142 = vector.shape_cast %141 : vector<1x16x128xbf16> to vector<16x128xbf16>
      %143 = vector.shape_cast %140 : vector<16x128xbf16> to vector<1x16x128xbf16>
      tpu.vector_store %arg23[%c1, %c0_85, %c0_86], %143 {strides = array<i32>} : memref<2x16x128xbf16, #tpu.memory_space<vmem>>, vector<1x16x128xbf16>,
      %144 = vector.extract_strided_slice %131 {offsets = [0, 128], sizes = [16, 128], strides = [1, 1]} : vector<16x256xbf16> to vector<16x128xbf16>
      %c1_87 = arith.constant 1 : index
      %c0_88 = arith.constant 0 : index
      %c0_89 = arith.constant 0 : index
      %145 = vector.load %arg24[%c1_87, %c0_88, %c0_89] : memref<2x16x128xbf16, #tpu.memory_space<vmem>>, vector<1x16x128xbf16>
      %146 = vector.shape_cast %145 : vector<1x16x128xbf16> to vector<16x128xbf16>
      %147 = vector.shape_cast %144 : vector<16x128xbf16> to vector<1x16x128xbf16>
      tpu.vector_store %arg24[%c1_87, %c0_88, %c0_89], %147 {strides = array<i32>} : memref<2x16x128xbf16, #tpu.memory_space<vmem>>, vector<1x16x128xbf16>,
    } else {
    }
    %c0 = arith.constant 0 : index
    %c0_1 = arith.constant 0 : index
    %c0_2 = arith.constant 0 : index
    %3 = vector.load %arg2[%c0, %c0_1, %c0_2] : memref<1x8x256xf32, #tpu.memory_space<vmem>>, vector<1x8x256xf32>
    %4 = vector.shape_cast %3 : vector<1x8x256xf32> to vector<8x256xf32>
    %5 = arith.truncf %4 : vector<8x256xf32> to vector<8x256xbf16>
    %c0_3 = arith.constant 0 : index
    %c0_4 = arith.constant 0 : index
    %6 = vector.load %arg5[%c0_3, %c0_4] : memref<256x256xbf16, #tpu.memory_space<vmem>>, vector<256x256xbf16>
    %cst = arith.constant dense<0.000000e+00> : vector<8x256xf32>
    %7 = tpu.matmul %5, %6, %cst {dimension_numbers = #tpu.dot_dimension_numbers<[1], [0], [0], [1], [0, 0, 1, 1], [], []>} : vector<8x256xbf16>, vector<256x256xbf16>, vector<8x256xf32> -> vector<8x256xf32>
    %c0_5 = arith.constant 0 : index
    %c0_6 = arith.constant 0 : index
    %8 = vector.load %arg6[%c0_5, %c0_6] : memref<1x256xf32, #tpu.memory_space<vmem>>, vector<1x256xf32>
    %9 = vector.broadcast %8 : vector<1x256xf32> to vector<8x256xf32>
    %10 = arith.addf %7, %9 : vector<8x256xf32>
    %11 = arith.truncf %10 : vector<8x256xf32> to vector<8x256xbf16>
    %12 = vector.extract_strided_slice %11 {offsets = [0, 0], sizes = [8, 128], strides = [1, 1]} : vector<8x256xbf16> to vector<8x128xbf16>
    %13 = vector.extract_strided_slice %11 {offsets = [0, 128], sizes = [8, 128], strides = [1, 1]} : vector<8x256xbf16> to vector<8x128xbf16>
    %14 = vector.shape_cast %12 : vector<8x128xbf16> to vector<1x8x128xbf16>
    %15 = vector.shape_cast %13 : vector<8x128xbf16> to vector<1x8x128xbf16>
    %16 = tpu.concatenate %14, %15 in 0 : vector<1x8x128xbf16>, vector<1x8x128xbf16> -> vector<2x8x128xbf16>
    %c0_7 = arith.constant 0 : index
    %c0_8 = arith.constant 0 : index
    %c0_9 = arith.constant 0 : index
    %17 = vector.load %arg23[%c0_7, %c0_8, %c0_9] : memref<2x16x128xbf16, #tpu.memory_space<vmem>>, vector<2x16x128xbf16>
    "tpu.trace_start"() <{level = 10 : i32, message = "hqd,hkd->hqk"}> : () -> ()
    %cst_10 = arith.constant dense<0.000000e+00> : vector<2x8x16xf32>
    %18 = tpu.matmul %16, %17, %cst_10 {dimension_numbers = #tpu.dot_dimension_numbers<[2], [2], [1], [1], [0, 0, 0, 1, 1, 1], [0], [0]>} : vector<2x8x128xbf16>, vector<2x16x128xbf16>, vector<2x8x16xf32> -> vector<2x8x16xf32>
    "tpu.trace_stop"() : () -> ()
    %c0_11 = arith.constant 0 : index
    %c0_12 = arith.constant 0 : index
    %c0_13 = arith.constant 0 : index
    %19 = vector.load %arg4[%c0_11, %c0_12, %c0_13] : memref<1x8x16xbf16, #tpu.memory_space<vmem>>, vector<1x8x16xbf16>
    %20 = vector.shape_cast %19 : vector<1x8x16xbf16> to vector<8x16xbf16>
    %21 = arith.extf %20 : vector<8x16xbf16> to vector<8x16xf32>
    %22 = vector.shape_cast %21 : vector<8x16xf32> to vector<1x8x16xf32>
    %23 = vector.broadcast %22 : vector<1x8x16xf32> to vector<2x8x16xf32>
    %24 = arith.addf %18, %23 : vector<2x8x16xf32>
    %cst_14 = arith.constant dense<0xFF800000> : vector<2x8xf32>
    %25 = vector.multi_reduction <maximumf>, %24, %cst_14 [2] : vector<2x8x16xf32> to vector<2x8xf32>
    %26 = vector.shape_cast %25 : vector<2x8xf32> to vector<2x8x1xf32>
    %27 = vector.broadcast %26 : vector<2x8x1xf32> to vector<2x8x16xf32>
    %28 = arith.subf %24, %27 : vector<2x8x16xf32>
    %29 = math.exp %28 : vector<2x8x16xf32>
    %cst_15 = arith.constant dense<0.000000e+00> : vector<2x8xf32>
    %30 = vector.multi_reduction <add>, %29, %cst_15 [2] : vector<2x8x16xf32> to vector<2x8xf32>
    %31 = vector.shape_cast %30 : vector<2x8xf32> to vector<2x8x1xf32>
    %32 = tpu.reciprocal %31 {approx = true} : vector<2x8x1xf32> -> vector<2x8x1xf32>
    %33 = vector.broadcast %32 : vector<2x8x1xf32> to vector<2x8x16xf32>
    %34 = arith.mulf %29, %33 : vector<2x8x16xf32>
    %35 = arith.truncf %34 : vector<2x8x16xf32> to vector<2x8x16xbf16>
    %c0_16 = arith.constant 0 : index
    %c0_17 = arith.constant 0 : index
    %c0_18 = arith.constant 0 : index
    %c0_19 = arith.constant 0 : index
    %36 = vector.load %arg22[%c0_16, %c0_17, %c0_18, %c0_19] : memref<1x2x8x16xbf16, #tpu.memory_space<vmem>>, vector<1x2x8x16xbf16>
    %37 = vector.shape_cast %36 : vector<1x2x8x16xbf16> to vector<2x8x16xbf16>
    %38 = vector.shape_cast %35 : vector<2x8x16xbf16> to vector<1x2x8x16xbf16>
    tpu.vector_store %arg22[%c0_16, %c0_17, %c0_18, %c0_19], %38 {strides = array<i32>} : memref<1x2x8x16xbf16, #tpu.memory_space<vmem>>, vector<1x2x8x16xbf16>,
    %c0_20 = arith.constant 0 : index
    %c0_21 = arith.constant 0 : index
    %c0_22 = arith.constant 0 : index
    %39 = vector.load %arg24[%c0_20, %c0_21, %c0_22] : memref<2x16x128xbf16, #tpu.memory_space<vmem>>, vector<2x16x128xbf16>
    "tpu.trace_start"() <{level = 10 : i32, message = "hqk,hkd->hqd"}> : () -> ()
    %cst_23 = arith.constant dense<0.000000e+00> : vector<2x8x128xf32>
    %40 = tpu.matmul %35, %39, %cst_23 {dimension_numbers = #tpu.dot_dimension_numbers<[2], [1], [1], [2], [0, 0, 0, 1, 1, 2], [0], [0]>} : vector<2x8x16xbf16>, vector<2x16x128xbf16>, vector<2x8x128xf32> -> vector<2x8x128xf32>
    "tpu.trace_stop"() : () -> ()
    %41 = vector.extract_strided_slice %40 {offsets = [0, 0, 0], sizes = [1, 8, 128], strides = [1, 1, 1]} : vector<2x8x128xf32> to vector<1x8x128xf32>
    %42 = vector.shape_cast %41 : vector<1x8x128xf32> to vector<8x128xf32>
    %43 = arith.truncf %42 : vector<8x128xf32> to vector<8x128xbf16>
    %c0_24 = arith.constant 0 : index
    %c0_25 = arith.constant 0 : index
    %44 = vector.load %arg25[%c0_24, %c0_25] : memref<8x256xbf16, #tpu.memory_space<vmem>>, vector<8x128xbf16>
    tpu.vector_store %arg25[%c0_24, %c0_25], %43 {strides = array<i32>} : memref<8x256xbf16, #tpu.memory_space<vmem>>, vector<8x128xbf16>,
    %45 = vector.extract_strided_slice %40 {offsets = [1, 0, 0], sizes = [1, 8, 128], strides = [1, 1, 1]} : vector<2x8x128xf32> to vector<1x8x128xf32>
    %46 = vector.shape_cast %45 : vector<1x8x128xf32> to vector<8x128xf32>
    %47 = arith.truncf %46 : vector<8x128xf32> to vector<8x128xbf16>
    %c0_26 = arith.constant 0 : index
    %c128 = arith.constant 128 : index
    %48 = vector.load %arg25[%c0_26, %c128] : memref<8x256xbf16, #tpu.memory_space<vmem>>, vector<8x128xbf16>
    tpu.vector_store %arg25[%c0_26, %c128], %47 {strides = array<i32>} : memref<8x256xbf16, #tpu.memory_space<vmem>>, vector<8x128xbf16>,
    %c0_27 = arith.constant 0 : index
    %c0_28 = arith.constant 0 : index
    %49 = vector.load %arg25[%c0_27, %c0_28] : memref<8x256xbf16, #tpu.memory_space<vmem>>, vector<8x256xbf16>
    %c0_29 = arith.constant 0 : index
    %c0_30 = arith.constant 0 : index
    %50 = vector.load %arg11[%c0_29, %c0_30] : memref<256x256xbf16, #tpu.memory_space<vmem>>, vector<256x256xbf16>
    %cst_31 = arith.constant dense<0.000000e+00> : vector<8x256xf32>
    %51 = tpu.matmul %49, %50, %cst_31 {dimension_numbers = #tpu.dot_dimension_numbers<[1], [0], [0], [1], [0, 0, 1, 1], [], []>} : vector<8x256xbf16>, vector<256x256xbf16>, vector<8x256xf32> -> vector<8x256xf32>
    %c0_32 = arith.constant 0 : index
    %c0_33 = arith.constant 0 : index
    %52 = vector.load %arg12[%c0_32, %c0_33] : memref<1x256xf32, #tpu.memory_space<vmem>>, vector<1x256xf32>
    %53 = vector.broadcast %52 : vector<1x256xf32> to vector<8x256xf32>
    %54 = arith.addf %51, %53 : vector<8x256xf32>
    %55 = arith.addf %54, %4 : vector<8x256xf32>
    %c0_34 = arith.constant 0 : index
    %c0_35 = arith.constant 0 : index
    %56 = vector.load %arg13[%c0_34, %c0_35] : memref<1x256xf32, #tpu.memory_space<vmem>>, vector<1x256xf32>
    %c0_36 = arith.constant 0 : index
    %c0_37 = arith.constant 0 : index
    %57 = vector.load %arg14[%c0_36, %c0_37] : memref<1x256xf32, #tpu.memory_space<vmem>>, vector<1x256xf32>
    %cst_38 = arith.constant dense<0.000000e+00> : vector<8xf32>
    %58 = vector.multi_reduction <add>, %55, %cst_38 [1] : vector<8x256xf32> to vector<8xf32>
    %59 = vector.shape_cast %58 : vector<8xf32> to vector<8x1xf32>
    %cst_39 = arith.constant 2.560000e+02 : f32
    %60 = vector.broadcast %cst_39 : f32 to vector<8x1xf32>
    %61 = arith.divf %59, %60 : vector<8x1xf32>
    %62 = vector.broadcast %61 : vector<8x1xf32> to vector<8x256xf32>
    %63 = arith.subf %55, %62 : vector<8x256xf32>
    %64 = arith.mulf %63, %63 : vector<8x256xf32>
    %cst_40 = arith.constant dense<0.000000e+00> : vector<8xf32>
    %65 = vector.multi_reduction <add>, %64, %cst_40 [1] : vector<8x256xf32> to vector<8xf32>
    %66 = vector.shape_cast %65 : vector<8xf32> to vector<8x1xf32>
    %cst_41 = arith.constant 2.560000e+02 : f32
    %67 = vector.broadcast %cst_41 : f32 to vector<8x1xf32>
    %68 = arith.divf %66, %67 : vector<8x1xf32>
    %cst_42 = arith.constant 9.99999974E-6 : f32
    %69 = vector.broadcast %cst_42 : f32 to vector<8x1xf32>
    %70 = arith.addf %68, %69 : vector<8x1xf32>
    %71 = math.rsqrt %70 : vector<8x1xf32>
    %72 = vector.broadcast %71 : vector<8x1xf32> to vector<8x256xf32>
    %73 = arith.mulf %63, %72 : vector<8x256xf32>
    %74 = vector.broadcast %56 : vector<1x256xf32> to vector<8x256xf32>
    %75 = arith.mulf %73, %74 : vector<8x256xf32>
    %76 = vector.broadcast %57 : vector<1x256xf32> to vector<8x256xf32>
    %77 = arith.addf %75, %76 : vector<8x256xf32>
    %78 = arith.truncf %77 : vector<8x256xf32> to vector<8x256xbf16>
    %c0_43 = arith.constant 0 : index
    %c0_44 = arith.constant 0 : index
    %79 = vector.load %arg15[%c0_43, %c0_44] : memref<256x512xbf16, #tpu.memory_space<vmem>>, vector<256x512xbf16>
    %cst_45 = arith.constant dense<0.000000e+00> : vector<8x512xf32>
    %80 = tpu.matmul %78, %79, %cst_45 {dimension_numbers = #tpu.dot_dimension_numbers<[1], [0], [0], [1], [0, 0, 1, 1], [], []>} : vector<8x256xbf16>, vector<256x512xbf16>, vector<8x512xf32> -> vector<8x512xf32>
    %c0_46 = arith.constant 0 : index
    %c0_47 = arith.constant 0 : index
    %81 = vector.load %arg16[%c0_46, %c0_47] : memref<1x512xf32, #tpu.memory_space<vmem>>, vector<1x512xf32>
    %82 = vector.broadcast %81 : vector<1x512xf32> to vector<8x512xf32>
    %83 = arith.addf %80, %82 : vector<8x512xf32>
    %cst_48 = arith.constant 0.000000e+00 : f32
    %84 = vector.broadcast %cst_48 : f32 to vector<8x512xf32>
    %85 = arith.maximumf %83, %84 : vector<8x512xf32>
    %86 = arith.truncf %85 : vector<8x512xf32> to vector<8x512xbf16>
    %c0_49 = arith.constant 0 : index
    %c0_50 = arith.constant 0 : index
    %87 = vector.load %arg17[%c0_49, %c0_50] : memref<512x256xbf16, #tpu.memory_space<vmem>>, vector<512x256xbf16>
    %cst_51 = arith.constant dense<0.000000e+00> : vector<8x256xf32>
    %88 = tpu.matmul %86, %87, %cst_51 {dimension_numbers = #tpu.dot_dimension_numbers<[1], [0], [0], [1], [0, 0, 1, 1], [], []>} : vector<8x512xbf16>, vector<512x256xbf16>, vector<8x256xf32> -> vector<8x256xf32>
    %c0_52 = arith.constant 0 : index
    %c0_53 = arith.constant 0 : index
    %89 = vector.load %arg18[%c0_52, %c0_53] : memref<1x256xf32, #tpu.memory_space<vmem>>, vector<1x256xf32>
    %90 = vector.broadcast %89 : vector<1x256xf32> to vector<8x256xf32>
    %91 = arith.addf %88, %90 : vector<8x256xf32>
    %92 = arith.addf %91, %77 : vector<8x256xf32>
    %c0_54 = arith.constant 0 : index
    %c0_55 = arith.constant 0 : index
    %93 = vector.load %arg19[%c0_54, %c0_55] : memref<1x256xf32, #tpu.memory_space<vmem>>, vector<1x256xf32>
    %c0_56 = arith.constant 0 : index
    %c0_57 = arith.constant 0 : index
    %94 = vector.load %arg20[%c0_56, %c0_57] : memref<1x256xf32, #tpu.memory_space<vmem>>, vector<1x256xf32>
    %cst_58 = arith.constant dense<0.000000e+00> : vector<8xf32>
    %95 = vector.multi_reduction <add>, %92, %cst_58 [1] : vector<8x256xf32> to vector<8xf32>
    %96 = vector.shape_cast %95 : vector<8xf32> to vector<8x1xf32>
    %cst_59 = arith.constant 2.560000e+02 : f32
    %97 = vector.broadcast %cst_59 : f32 to vector<8x1xf32>
    %98 = arith.divf %96, %97 : vector<8x1xf32>
    %99 = vector.broadcast %98 : vector<8x1xf32> to vector<8x256xf32>
    %100 = arith.subf %92, %99 : vector<8x256xf32>
    %101 = arith.mulf %100, %100 : vector<8x256xf32>
    %cst_60 = arith.constant dense<0.000000e+00> : vector<8xf32>
    %102 = vector.multi_reduction <add>, %101, %cst_60 [1] : vector<8x256xf32> to vector<8xf32>
    %103 = vector.shape_cast %102 : vector<8xf32> to vector<8x1xf32>
    %cst_61 = arith.constant 2.560000e+02 : f32
    %104 = vector.broadcast %cst_61 : f32 to vector<8x1xf32>
    %105 = arith.divf %103, %104 : vector<8x1xf32>
    %cst_62 = arith.constant 9.99999974E-6 : f32
    %106 = vector.broadcast %cst_62 : f32 to vector<8x1xf32>
    %107 = arith.addf %105, %106 : vector<8x1xf32>
    %108 = math.rsqrt %107 : vector<8x1xf32>
    %109 = vector.broadcast %108 : vector<8x1xf32> to vector<8x256xf32>
    %110 = arith.mulf %100, %109 : vector<8x256xf32>
    %111 = vector.broadcast %93 : vector<1x256xf32> to vector<8x256xf32>
    %112 = arith.mulf %110, %111 : vector<8x256xf32>
    %113 = vector.broadcast %94 : vector<1x256xf32> to vector<8x256xf32>
    %114 = arith.addf %112, %113 : vector<8x256xf32>
    %c0_63 = arith.constant 0 : index
    %c0_64 = arith.constant 0 : index
    %c0_65 = arith.constant 0 : index
    %115 = vector.load %arg21[%c0_63, %c0_64, %c0_65] : memref<1x8x256xf32, #tpu.memory_space<vmem>>, vector<1x8x256xf32>
    %116 = vector.shape_cast %115 : vector<1x8x256xf32> to vector<8x256xf32>
    %117 = vector.shape_cast %114 : vector<8x256xf32> to vector<1x8x256xf32>
    tpu.vector_store %arg21[%c0_63, %c0_64, %c0_65], %117 {strides = array<i32>} : memref<1x8x256xf32, #tpu.memory_space<vmem>>, vector<1x8x256xf32>,
    return
  }
  func.func @transform_0(%arg0: i32, %arg1: i32) -> (i32, i32, i32) {
    %c0_i32 = arith.constant 0 : i32
    %c0_i32_0 = arith.constant 0 : i32
    return %arg0, %arg1, %c0_i32 : i32, i32, i32
  }
  func.func @transform_1(%arg0: i32, %arg1: i32) -> (i32, i32, i32) {
    %c0_i32 = arith.constant 0 : i32
    %c0_i32_0 = arith.constant 0 : i32
    %c0_i32_1 = arith.constant 0 : i32
    return %arg0, %c0_i32, %c0_i32_0 : i32, i32, i32
  }
  func.func @transform_2(%arg0: i32, %arg1: i32) -> (i32, i32, i32) {
    %c0_i32 = arith.constant 0 : i32
    %c0_i32_0 = arith.constant 0 : i32
    return %arg0, %arg1, %c0_i32 : i32, i32, i32
  }
  func.func @transform_3(%arg0: i32, %arg1: i32) -> (i32, i32) {
    %c0_i32 = arith.constant 0 : i32
    %c0_i32_0 = arith.constant 0 : i32
    %c0_i32_1 = arith.constant 0 : i32
    return %c0_i32, %c0_i32_0 : i32, i32
  }
  func.func @transform_4(%arg0: i32, %arg1: i32) -> (i32, i32) {
    %c0_i32 = arith.constant 0 : i32
    %c0_i32_0 = arith.constant 0 : i32
    %c0_i32_1 = arith.constant 0 : i32
    return %c0_i32, %c0_i32_0 : i32, i32
  }
  func.func @transform_5(%arg0: i32, %arg1: i32) -> (i32, i32) {
    %c0_i32 = arith.constant 0 : i32
    %c0_i32_0 = arith.constant 0 : i32
    %c0_i32_1 = arith.constant 0 : i32
    return %c0_i32, %c0_i32_0 : i32, i32
  }
  func.func @transform_6(%arg0: i32, %arg1: i32) -> (i32, i32) {
    %c0_i32 = arith.constant 0 : i32
    %c0_i32_0 = arith.constant 0 : i32
    %c0_i32_1 = arith.constant 0 : i32
    return %c0_i32, %c0_i32_0 : i32, i32
  }
  func.func @transform_7(%arg0: i32, %arg1: i32) -> (i32, i32) {
    %c0_i32 = arith.constant 0 : i32
    %c0_i32_0 = arith.constant 0 : i32
    %c0_i32_1 = arith.constant 0 : i32
    return %c0_i32, %c0_i32_0 : i32, i32
  }
  func.func @transform_8(%arg0: i32, %arg1: i32) -> (i32, i32) {
    %c0_i32 = arith.constant 0 : i32
    %c0_i32_0 = arith.constant 0 : i32
    %c0_i32_1 = arith.constant 0 : i32
    return %c0_i32, %c0_i32_0 : i32, i32
  }
  func.func @transform_9(%arg0: i32, %arg1: i32) -> (i32, i32) {
    %c0_i32 = arith.constant 0 : i32
    %c0_i32_0 = arith.constant 0 : i32
    %c0_i32_1 = arith.constant 0 : i32
    return %c0_i32, %c0_i32_0 : i32, i32
  }
  func.func @transform_10(%arg0: i32, %arg1: i32) -> (i32, i32) {
    %c0_i32 = arith.constant 0 : i32
    %c0_i32_0 = arith.constant 0 : i32
    %c0_i32_1 = arith.constant 0 : i32
    return %c0_i32, %c0_i32_0 : i32, i32
  }
  func.func @transform_11(%arg0: i32, %arg1: i32) -> (i32, i32) {
    %c0_i32 = arith.constant 0 : i32
    %c0_i32_0 = arith.constant 0 : i32
    %c0_i32_1 = arith.constant 0 : i32
    return %c0_i32, %c0_i32_0 : i32, i32
  }
  func.func @transform_12(%arg0: i32, %arg1: i32) -> (i32, i32) {
    %c0_i32 = arith.constant 0 : i32
    %c0_i32_0 = arith.constant 0 : i32
    %c0_i32_1 = arith.constant 0 : i32
    return %c0_i32, %c0_i32_0 : i32, i32
  }
  func.func @transform_13(%arg0: i32, %arg1: i32) -> (i32, i32) {
    %c0_i32 = arith.constant 0 : i32
    %c0_i32_0 = arith.constant 0 : i32
    %c0_i32_1 = arith.constant 0 : i32
    return %c0_i32, %c0_i32_0 : i32, i32
  }
  func.func @transform_14(%arg0: i32, %arg1: i32) -> (i32, i32) {
    %c0_i32 = arith.constant 0 : i32
    %c0_i32_0 = arith.constant 0 : i32
    %c0_i32_1 = arith.constant 0 : i32
    return %c0_i32, %c0_i32_0 : i32, i32
  }
  func.func @transform_15(%arg0: i32, %arg1: i32) -> (i32, i32) {
    %c0_i32 = arith.constant 0 : i32
    %c0_i32_0 = arith.constant 0 : i32
    %c0_i32_1 = arith.constant 0 : i32
    return %c0_i32, %c0_i32_0 : i32, i32
  }
  func.func @transform_16(%arg0: i32, %arg1: i32) -> (i32, i32) {
    %c0_i32 = arith.constant 0 : i32
    %c0_i32_0 = arith.constant 0 : i32
    %c0_i32_1 = arith.constant 0 : i32
    return %c0_i32, %c0_i32_0 : i32, i32
  }
  func.func @transform_17(%arg0: i32, %arg1: i32) -> (i32, i32) {
    %c0_i32 = arith.constant 0 : i32
    %c0_i32_0 = arith.constant 0 : i32
    %c0_i32_1 = arith.constant 0 : i32
    return %c0_i32, %c0_i32_0 : i32, i32
  }
  func.func @transform_18(%arg0: i32, %arg1: i32) -> (i32, i32) {
    %c0_i32 = arith.constant 0 : i32
    %c0_i32_0 = arith.constant 0 : i32
    %c0_i32_1 = arith.constant 0 : i32
    return %c0_i32, %c0_i32_0 : i32, i32
  }
  func.func @transform_19(%arg0: i32, %arg1: i32) -> (i32, i32, i32) {
    %c0_i32 = arith.constant 0 : i32
    %c0_i32_0 = arith.constant 0 : i32
    return %arg0, %arg1, %c0_i32 : i32, i32, i32
  }
  func.func @transform_20(%arg0: i32, %arg1: i32) -> (i32, i32, i32, i32) {
    %c0_i32 = arith.constant 0 : i32
    %c0_i32_0 = arith.constant 0 : i32
    %c0_i32_1 = arith.constant 0 : i32
    return %arg0, %c0_i32, %arg1, %c0_i32_0 : i32, i32, i32, i32
  }
}

</mosaic_0001>

<bundles_post_ra>
// kernel: tpu_custom_call.1
= control target key start
LH: loop header
LB: loop body
LE: loop exit
PB: predicated region body
PF: predicated region fallthrough
CT: control target
= control target key end

     0   :  { %s5499_s0 = inlined_call_operand.hbm [shape: f32[2,16,256], index: 0, kind: input, shape index: {}]   ;;  %s5500_s1 = inlined_call_operand.hbm [shape: bf16[2,16,256], index: 1, kind: input, shape index: {}]   ;;  %s5501_s2 = inlined_call_operand.hbm [shape: bf16[2,16,16], index: 2, kind: input, shape index: {}]   ;;  %s5502_s3 = inlined_call_operand.hbm [shape: bf16[256,256], index: 3, kind: input, shape index: {}]   ;;  %s5503_s4 = inlined_call_operand.vmem [shape: f32[1,256], index: 4, kind: input, shape index: {}]   ;;  %s5504_s5 = inlined_call_operand.hbm [shape: bf16[256,256], index: 5, kind: input, shape index: {}]   ;;  %s5505_s6 = inlined_call_operand.vmem [shape: f32[1,256], index: 6, kind: input, shape index: {}]   ;;  %s5506_s7 = inlined_call_operand.hbm [shape: bf16[256,256], index: 7, kind: input, shape index: {}]   ;;  %s5507_s8 = inlined_call_operand.vmem [shape: f32[1,256], index: 8, kind: input, shape index: {}]   ;;  %s5508_s9 = inlined_call_operand.hbm [shape: bf16[256,256], index: 9, kind: input, shape index: {}]   ;;  %s5509_s10 = inlined_call_operand.vmem [shape: f32[1,256], index: 10, kind: input, shape index: {}]   ;;  %s5510_s11 = inlined_call_operand.vmem [shape: f32[1,256], index: 11, kind: input, shape index: {}]   ;;  %s5511_s12 = inlined_call_operand.vmem [shape: f32[1,256], index: 12, kind: input, shape index: {}]   ;;  %s5512_s13 = inlined_call_operand.hbm [shape: bf16[256,512], index: 13, kind: input, shape index: {}]   ;;  %s5513_s14 = inlined_call_operand.vmem [shape: f32[1,512], index: 14, kind: input, shape index: {}]   ;;  %s5514_s15 = inlined_call_operand.hbm [shape: bf16[512,256], index: 15, kind: input, shape index: {}]   ;;  %s5515_s16 = inlined_call_operand.vmem [shape: f32[1,256], index: 16, kind: input, shape index: {}]   ;;  %s5516_s17 = inlined_call_operand.vmem [shape: f32[1,256], index: 17, kind: input, shape index: {}]   ;;  %s5517_s18 = inlined_call_operand.vmem [shape: f32[1,256], index: 18, kind: input, shape index: {}]   ;;  %s5518_s19 = inlined_call_operand.hbm [shape: f32[2,16,256], index: 19, kind: output, shape index: {0}]   ;;  %s5519_s20 = inlined_call_operand.hbm [shape: bf16[2,2,16,16], index: 20, kind: output, shape index: {1}]  }
   0x1   :  { %5533 = sst [smem:[#allocation38_spill]] %s5499_s0 }
   0x2   :  { %5534 = sst [smem:[#allocation39_spill]] %s5500_s1 }
   0x3   :  { %5535 = sst [smem:[#allocation40_spill]] %s5501_s2 }
   0x4   :  { %5536 = sst [smem:[#allocation41_spill]] %s5502_s3 }
   0x5   :  { %5537 = sst [smem:[#allocation42_spill]] %s5503_s4 }
   0x6   :  { %5538 = sst [smem:[#allocation43_spill]] %s5504_s5 }
   0x7   :  { %5539 = sst [smem:[#allocation44_spill]] %s5505_s6 }
   0x8   :  { %5540 = sst [smem:[#allocation45_spill]] %s5506_s7 }
   0x9   :  { %5541 = sst [smem:[#allocation46_spill]] %s5507_s8 }
   0xa   :  { %5542 = sst [smem:[#allocation47_spill]] %s5508_s9 }
   0xb   :  { %5543 = sst [smem:[#allocation48_spill]] %s5509_s10 }
   0xc   :  { %5544 = sst [smem:[#allocation49_spill]] %s5510_s11 }
   0xd   :  { %5545 = sst [smem:[#allocation50_spill]] %s5511_s12 }
   0xe   :  { %5546 = sst [smem:[#allocation51_spill]] %s5512_s13 }
   0xf   :  { %5547 = sst [smem:[#allocation52_spill]] %s5513_s14 }
  0x10   :  { %5548 = sst [smem:[#allocation53_spill]] %s5514_s15 }
  0x11   :  { %5549 = sst [smem:[#allocation54_spill]] %s5515_s16 }
  0x12   :  { %5550 = sst [smem:[#allocation55_spill]] %s5516_s17 }
  0x13   :  { %5551 = sst [smem:[#allocation56_spill]] %s5517_s18 }
  0x14   :  { %5552 = sst [smem:[#allocation57_spill]] %s5518_s19 }
  0x15   :  { %5553 = sst [smem:[#allocation58_spill]] %s5519_s20 }
  0x16   :  { %26 = vsyncpa [#allocation6], 0 }
  0x17   :  { %28 = vsyncpa [#allocation6 + $0x1], 0 }
  0x18   :  { %29 = vsyncpa [#allocation9], 0 }
  0x19   :  { %31 = vsyncpa [#allocation9 + $0x1], 0 }
  0x1a   :  { %32 = vsyncpa [#allocation12], 0 }
  0x1b   :  { %33 = vsyncpa [#allocation15], 0 }
  0x1c   :  { %34 = vsyncpa [#allocation18], 0 }
  0x1d   :  { %35 = vsyncpa [#allocation7], 0 }
  0x1e   :  { %37 = vsyncpa [#allocation7 + $0x1], 0 }
  0x1f   :  { %38 = vsyncpa [#allocation22], 0 }
  0x20   :  { %40 = vsyncpa [#allocation22 + $0x1], 0  ;;  %s4975_s1 = smov 0   ;;  %s4977_s22 = smov 0  }
  0x21   :  { %s4979_s23 = smov 0   ;;  %s4981_s24 = smov 0  }
  0x22   :  { %s4983_s2 = smov 0   ;;  %s4985_s25 = smov 0  }
  0x23   :  { %s4987_s3 = smov 0   ;;  %s4989_s26 = smov 0  }
  0x24   :  { %s4991_s27 = smov 0   ;;  %s4993_s28 = smov 0  }
  0x25   :  { %s4995_s4 = smov 0  }
  0x26 LB: > { %5554 = sst [smem:[#allocation31_spill]] %s4828_s25  ;;  %s5031_s29 = sadd.s32 4294967295, %s4848_s4   ;;  %s4848_s4 = sphi %s4995_s4, %s46_s4   ;;  %s4844_s28 = sphi %s4993_s28, %s5618_s28   ;;  %s4840_s27 = sphi %s4991_s27, %s5617_s27   ;;  %s4836_s26 = sphi %s4989_s26, %s5616_s26   ;;  %s4832_s3 = sphi %s4987_s3, %s5615_s3   ;;  %s4828_s25 = sphi %s4985_s25, %s5607_s25   ;;  %s4824_s2 = sphi %s4983_s2, %s5614_s2   ;;  %s4820_s24 = sphi %s4981_s24, %s5613_s24   ;;  %s4816_s23 = sphi %s4979_s23, %s5612_s23   ;;  %s4812_s22 = sphi %s4977_s22, %s5611_s22   ;;  %s4808_s1 = sphi %s4975_s1, %s5610_s1  }
  0x27   : > { %5555 = sst [smem:[#allocation32_spill]] %s4836_s26  ;;  %p3466_p0 = scmp.ge.s32.totalorder %s4848_s4, 1 }
  0x28   : > { %p5528_p1 = scmp.eq.s32.totalorder %s5031_s29, 0  ;;  %p537_p2 = scmp.lt.s32.totalorder %s4848_s4, 5 }
  0x29   : > { %s4850_s0 = smov [#allocation11]   ;;  %s4851_s18 = smov [#allocation14]  }
  0x2a   : > { %p5036_p3 = pnand %p3466_p0, %p537_p2  ;;  %s549_s21 = sshll.u32 %s4850_s0, 4  ;;  %s550_s21 = int_to_ptr.vmem [resolvable:$true] %s549_s21 }
  0x2b   : > { %s581_s17 = sshll.u32 %s4851_s18, 4  ;;  %s4852_s20 = smov [#allocation17]   ;;  %s582_s17 = int_to_ptr.vmem [resolvable:$true] %s581_s17 }
  0x2c   : > { %p3882_p4 = pneg %p5036_p3  ;;  %s619_s26 = sshll.u32 %s4852_s20, 4  ;;  %s620_s26 = int_to_ptr.vmem [resolvable:$true] %s619_s26 }
  0x2d   : > { %s4449_s0 = scalar_lea.vmem %s550_s21, 4096  ;;  %p4457_p10 = scmp.lt.s32.totalorder %s550_s21, %s550_s21 }
  0x2e   : > { %p5044_p5 = pnand %p3882_p4, %p5528_p1  ;;  %p4450_p7 = scmp.ne.s32.totalorder %s550_s21, %s4449_s0 }
  0x2f   : > { %p4458_p11 = scmp.lt.s32.totalorder %s4449_s0, %s4449_s0 }
  0x30   : > { %p5050_p6 = pneg %p5044_p5 }
  0x31   : > { %p4459_p12 = por %p4458_p11, %p4457_p10 }
  0x32   : > { %p4452_p8 = pnand %p4450_p7, %p5050_p6 }
  0x34   : > { %p4453_p9 = pneg %p4452_p8 }
  0x36   : > { %p4460_p13 = pnand %p4459_p12, %p4453_p9 }
  0x38   : > { %4463 = shalt.err (!%p4460_p13)
}
  0x39   : > { %s5523_s18 = smov 128   ;;  %s5525_s20 = smov 8  }
  0x3a   : > { %s5559_s11 = sld [smem:[#allocation41_spill]]  ;;  %s4475_s10 = scalar_lea.vmem %s582_s17, 4096 }
  0x3b   : > { %p4476_p0 = scmp.ne.s32.totalorder %s582_s17, %s4475_s10  ;;  %p4483_p7 = scmp.lt.s32.totalorder %s582_s17, %s582_s17 }
  0x3c   : > { %p4484_p8 = scmp.lt.s32.totalorder %s4475_s10, %s4475_s10 }
  0x3d   : > { %p4478_p2 = pnand %p4476_p0, %p5050_p6 }
  0x3e   : > { %p4485_p9 = por %p4484_p8, %p4483_p7 }
  0x3f   : > { %p4479_p4 = pneg %p4478_p2 }
  0x40   : > { %3885 = dma.hbm_to_vmem [thread:$0]  (!%p5044_p5), %s5559_s11, 4096, %s550_s21, [#allocation12], %s5523_s18, %s5523_s18, %s5525_s20  }
  0x41   : > { %p4486_p10 = pnand %p4485_p9, %p4479_p4 }
  0x43   : > { %4489 = shalt.err (!%p4486_p10)
}
  0x44   : > { %s5560_s7 = sld [smem:[#allocation45_spill]]  ;;  %s4501_s11 = scalar_lea.vmem %s620_s26, 8192 }
  0x45   : > { %p4502_p11 = scmp.ne.s32.totalorder %s620_s26, %s4501_s11  ;;  %p4509_p0 = scmp.lt.s32.totalorder %s620_s26, %s620_s26 }
  0x46   : > { %p4510_p2 = scmp.lt.s32.totalorder %s4501_s11, %s4501_s11 }
  0x47   : > { %p4504_p12 = pnand %p4502_p11, %p5050_p6 }
  0x48   : > { %p4511_p4 = por %p4510_p2, %p4509_p0 }
  0x49   : > { %p4505_p13 = pneg %p4504_p12 }
  0x4a   : > { %3891 = dma.hbm_to_vmem [thread:$0]  (!%p5044_p5), %s5560_s7, 4096, %s582_s17, [#allocation15], %s5523_s18, %s5523_s18, %s5525_s20  }
  0x4b   : > { %p4512_p7 = pnand %p4511_p4, %p4505_p13 }
  0x4d   : > { %4515 = shalt.err (!%p4512_p7)
}
  0x4e   : > { %s4855_s10 = smov 256   ;;  %s4856_s8 = smov 16  }
  0x4f   : > { %s5561_s13 = sld [smem:[#allocation51_spill]]  ;;  %p75_p8 = scmp.eq.s32.totalorder %s4848_s4, 0 }
  0x50   : > { %p100_p9 = scmp.ne.s32.totalorder %s4816_s23, %s4812_s22  ;;  %p106_p10 = scmp.ne.s32.totalorder %s4812_s22, %s4808_s1 }
  0x51   : > { %p5527_p11 = scmp.lt.s32.totalorder %s4848_s4, 4  ;;  %s679_s21 = sand.u32 1, %s4848_s4  }
  0x52   : > { %p102_p12 = por %p100_p9, %p75_p8  ;;  %p5093_p13 = por %p106_p10, %p5528_p1 }
  0x53   : > { %s681_s11 = sand.u32 1, %s4816_s23   ;;  %s3780_s18 = sshll.u32 %s4844_s28, 8 }
  0x54   : > { %s3478_s20 = sshll.u32 %s681_s11, 4  ;;  %s5563_s12 = sld [smem:[#allocation39_spill]] }
  0x55   : > { %3897 = dma.hbm_to_vmem [thread:$0]  (!%p5044_p5), %s5561_s13, 8192, %s620_s26, [#allocation18], %s4855_s10, %s4855_s10, %s4856_s8  }
  0x56   : > { %p5104_p0 = pnand %p5527_p11, %p102_p12  ;;  %s683_s1 = scalar_lea.vmem [#allocation8], %s3478_s20 }
  0x57   : > { %s690_s8 = sshll.u32 %s683_s1, 4  ;;  %s5108_s14 = scalar_lea.sflag [#allocation9], %s679_s21  ;;  %s691_s8 = int_to_ptr.vmem [resolvable:$true] %s690_s8 }
  0x58   : > { %p4518_p2 = pneg %p5104_p0  ;;  %s4529_s17 = scalar_lea.vmem %s691_s8, 256 }
  0x59   : > { %p4530_p4 = scmp.ne.s32.totalorder %s691_s8, %s4529_s17  ;;  %s4857_s11 = smov [#allocation8]  }
  0x5a   : > { %s689_s26 = scalar_lea.hbm %s5563_s12, %s3780_s18  ;;  %s4534_s6 = sshll.u32 %s4857_s11, 4  ;;  %s4535_s6 = int_to_ptr.vmem [resolvable:$false] %s4534_s6 }
  0x5b   : > { %p4532_p7 = pnand %p4530_p4, %p4518_p2  ;;  %s4536_s7 = scalar_lea.vmem %s4535_s6, 512 }
  0x5c   : > { %p4537_p10 = scmp.lt.s32.totalorder %s691_s8, %s4535_s6  ;;  %p4538_p12 = scmp.lt.s32.totalorder %s4536_s7, %s4529_s17 }
  0x5d   : > { %p4533_p9 = pneg %p4532_p7 }
  0x5e   : > { %p4539_p11 = por %p4538_p12, %p4537_p10 }
  0x60   : > { %p4540_p1 = pnand %p4539_p11, %p4533_p9 }
  0x62   : > { %4543 = shalt.err (!%p4540_p1)
}
  0x63   : > { %s5565_s18 = smov 8   ;;  %s5566_s20 = smov 128  }
  0x64   : > { %3907 = dma.hbm_to_vmem [thread:$0]  (!%p5104_p0), %s689_s26, 256, %s691_s8, %s5108_s14, %s5566_s20, %s5566_s20, %s5565_s18  }
  0x65   : > { %s4858_s21 = smov [#allocation13]   ;;  %s4859_s1 = smov [#allocation16]  }
  0x66   : > { %s565_s12 = sshll.u32 %s4858_s21, 4  ;;  %s597_s11 = sshll.u32 %s4859_s1, 4  ;;  %s566_s12 = int_to_ptr.vmem [resolvable:$true] %s565_s12  ;;  %s598_s11 = int_to_ptr.vmem [resolvable:$true] %s597_s11 }
  0x67   : > { %s4555_s13 = scalar_lea.vmem %s566_s12, 4096  ;;  %p4563_p11 = scmp.lt.s32.totalorder %s566_s12, %s566_s12 }
  0x68   : > { %p4556_p2 = scmp.ne.s32.totalorder %s566_s12, %s4555_s13  ;;  %p4564_p1 = scmp.lt.s32.totalorder %s4555_s13, %s4555_s13 }
  0x6a   : > { %p4558_p4 = pnand %p4556_p2, %p5050_p6  ;;  %p4565_p9 = por %p4564_p1, %p4563_p11 }
  0x6c   : > { %p4559_p7 = pneg %p4558_p4 }
  0x6e   : > { %p4566_p10 = pnand %p4565_p9, %p4559_p7 }
  0x70   : > { %4569 = shalt.err (!%p4566_p10)
}
  0x71   : > { %s5567_s5 = sld [smem:[#allocation43_spill]]  ;;  %s4581_s10 = scalar_lea.vmem %s598_s11, 4096 }
  0x72   : > { %p4582_p0 = scmp.ne.s32.totalorder %s598_s11, %s4581_s10  ;;  %p4589_p4 = scmp.lt.s32.totalorder %s598_s11, %s598_s11 }
  0x73   : > { %p4590_p11 = scmp.lt.s32.totalorder %s4581_s10, %s4581_s10 }
  0x74   : > { %p4584_p12 = pnand %p4582_p0, %p5050_p6 }
  0x75   : > { %p4591_p7 = por %p4590_p11, %p4589_p4 }
  0x76   : > { %p4585_p2 = pneg %p4584_p12 }
  0x77   : > { %3888 = dma.hbm_to_vmem [thread:$0]  (!%p5044_p5), %s5567_s5, 4096, %s566_s12, [#allocation12], %s5566_s20, %s5566_s20, %s5565_s18  }
  0x78   : > { %p4592_p1 = pnand %p4591_p7, %p4585_p2 }
  0x7a   : > { %4595 = shalt.err (!%p4592_p1)
}
  0x7b   : > { %s5568_s9 = sld [smem:[#allocation47_spill]]  ;;  %s4860_s6 = smov [#allocation19]  }
  0x7c   : > { %s635_s7 = sshll.u32 %s4860_s6, 4  ;;  %s636_s7 = int_to_ptr.vmem [resolvable:$true] %s635_s7 }
  0x7d   : > { %s4607_s21 = scalar_lea.vmem %s636_s7, 8192  ;;  %p4615_p12 = scmp.lt.s32.totalorder %s636_s7, %s636_s7 }
  0x7e   : > { %p4608_p9 = scmp.ne.s32.totalorder %s636_s7, %s4607_s21  ;;  %p4616_p2 = scmp.lt.s32.totalorder %s4607_s21, %s4607_s21 }
  0x80   : > { %p4610_p10 = pnand %p4608_p9, %p5050_p6  ;;  %p4617_p4 = por %p4616_p2, %p4615_p12 }
  0x81   : > { %3894 = dma.hbm_to_vmem [thread:$0]  (!%p5044_p5), %s5568_s9, 4096, %s598_s11, [#allocation15], %s5566_s20, %s5566_s20, %s5565_s18  }
  0x82   : > { %p4611_p0 = pneg %p4610_p10 }
  0x84   : > { %p4618_p11 = pnand %p4617_p4, %p4611_p0 }
  0x86   : > { %4621 = shalt.err (!%p4618_p11)
}
  0x87   : > { %s5569_s15 = sld [smem:[#allocation53_spill]]  ;;  %s3465_s16 = sadd.s32 4294967294, %s4848_s4  }
  0x88   : > { %s55_s19 = sadd.s32 1, %s4840_s27  ;;  %s58_s11 = sadd.s32 1, %s4844_s28 }
  0x89   : > { %p56_p6 = scmp.ge.s32.totalorder %s55_s19, 2  ;;  %s67_s17 = sadd.s32 1, %s4828_s25 }
  0x8a   : > { %p74_p7 = scmp.ne.s32.totalorder %s4828_s25, %s4824_s2  ;;  %p80_p9 = scmp.ne.s32.totalorder %s4824_s2, %s4820_s24 }
  0x8b   : > { %s5620_s19 = smov (%p56_p6, %s55_s19), 0  ;;  %s5622_s11 = smov (!%p56_p6, %s58_s11), %s4844_s28 }
  0x8c   : > { %5570 = sst [smem:[#allocation33_spill]] %s5620_s19  ;;  %s63_s26 = ssub.s32 %s4840_s27, %s5620_s19 }
  0x8d   : > { %3900 = dma.hbm_to_vmem [thread:$0]  (!%p5044_p5), %s5569_s15, 8192, %s636_s7, [#allocation18], %s5566_s20, %s5566_s20, %s5565_s18  }
  0x8e   : > { %p5161_p1 = por %p75_p8, %p74_p7  ;;  %p60_p5 = scmp.ge.s32.totalorder %s5622_s11, 2 }
  0x8f   : > { %p496_p10 = scmp.eq.s32.totalorder %s5031_s29, 3  ;;  %p502_p0 = scmp.eq.s32.totalorder %s3465_s16, 3 }
  0x90   : > { %s5624_s11 = smov (%p60_p5, %s5622_s11), 0  ;;  %p5573_p12 = scmp.eq.s32.totalorder %s5031_s29, 0 }
  0x91   : > { %5572 = sst [smem:[#allocation34_spill]] %s5624_s11  ;;  %p5176_p4 = por %p496_p10, %p74_p7 }
  0x92   : > { %p5172_p2 = por %p5573_p12, %p80_p9  ;;  %s62_s13 = ssub.s32 %s4844_s28, %s5624_s11 }
  0x93   : > { %p5182_p8 = por %p502_p0, %p80_p9  ;;  %s64_s6 = sor.u32 %s63_s26, %s62_s13 }
  0x94   : > { %p91_p11 = scmp.eq.s32.totalorder %s62_s13, 0  ;;  %p65_p6 = scmp.eq.s32.totalorder %s64_s6, 0 }
  0x95   : > { %s5576_s8 = scalar_select %p5182_p8, 1, 0 }
  0x96   : > { %s5187_s7 = sand.u32 1, %s4828_s25   ;;  %s5578_s21 = sadd.s32 1, %s4816_s23 }
  0x97   : > { %5577 = sst [smem:[#allocation35_spill]] %s5576_s8  ;;  %s3474_s16 = sshll.u32 %s5187_s7, 4 }
  0x98   : > { %s5192_s12 = scalar_select %p91_p11, %s4816_s23, %s5578_s21  }
  0x99   : > { %s5195_s1 = scalar_select %p65_p6, %s4828_s25, %s67_s17  }
  0x9a   : > { %5579 = sst [smem:[#allocation36_spill]] %s5192_s12  ;;  %s3475_s5 = sshll.u32 %s4840_s27, 1 }
  0x9b   : > { %5580 = sst [smem:[#allocation37_spill]] %s5195_s1  ;;  %s3476_s9 = sshll.u32 %s4844_s28, 2 }
  0x9c   : > { %s662_s15 = scalar_lea.vmem [#allocation5], %s3474_s16  ;;  %s668_s19 = sadd.s32 %s3476_s9, %s3475_s5 }
  0x9d   : > { %s672_s11 = sshll.u32 %s662_s15, 4  ;;  %s3477_s26 = sshll.u32 %s668_s19, 7  ;;  %s673_s11 = int_to_ptr.vmem [resolvable:$true] %s672_s11 }
  0x9e   : > { %p5581_p7 = scmp.lt.s32.totalorder %s4848_s4, 4  ;;  %s5583_s21 = sld [smem:[#allocation38_spill]] }
  0x9f   : > { %s3481_s1 = sshll.u32 %s5187_s7, 2  ;;  %s659_s25 = scalar_lea.sflag [#allocation6], %s5187_s7 }
  0xa0   : > { %p5204_p5 = pnand %p5581_p7, %p5161_p1  ;;  %s4635_s15 = scalar_lea.vmem %s673_s11, 256 }
  0xa1   : > { %p4636_p10 = scmp.ne.s32.totalorder %s673_s11, %s4635_s15  ;;  %s4861_s5 = smov [#allocation5]  }
  0xa2   : > { %p4624_p9 = pneg %p5204_p5  ;;  %s4640_s9 = sshll.u32 %s4861_s5, 4  ;;  %s4641_s9 = int_to_ptr.vmem [resolvable:$false] %s4640_s9 }
  0xa3   : > { %s4642_s19 = scalar_lea.vmem %s4641_s9, 512  ;;  %p4643_p1 = scmp.lt.s32.totalorder %s673_s11, %s4641_s9 }
  0xa4   : > { %s670_s17 = scalar_lea.hbm %s5583_s21, %s3477_s26  ;;  %p4638_p0 = pnand %p4636_p10, %p4624_p9 }
  0xa5   : > { %p4644_p11 = scmp.lt.s32.totalorder %s4642_s19, %s4635_s15 }
  0xa6   : > { %p4639_p12 = pneg %p4638_p0 }
  0xa7   : > { %p4645_p6 = por %p4644_p11, %p4643_p1 }
  0xa9   : > { %p4646_p7 = pnand %p4645_p6, %p4639_p12 }
  0xab   : > { %4649 = shalt.err (!%p4646_p7)
}
  0xac   : > { %3904 = dma.hbm_to_vmem [thread:$0]  (!%p5204_p5), %s670_s17, 256, %s673_s11, %s659_s25  }
  0xad   : > { %s3482_s18 = sshll.u32 %s4844_s28, 1  ;;  %s704_s8 = scalar_lea.vmem [#allocation10], %s3481_s1 }
  0xae   : > { %s713_s7 = sshll.u32 %s704_s8, 4  ;;  %s709_s16 = sadd.s32 %s4840_s27, %s3482_s18  ;;  %s714_s7 = int_to_ptr.vmem [resolvable:$true] %s713_s7 }
  0xaf   : > { %s3483_s26 = sshll.u32 %s709_s16, 6  ;;  %s5584_s5 = sld [smem:[#allocation40_spill]] }
  0xb0   : > { %s4663_s15 = scalar_lea.vmem %s714_s7, 64  ;;  %s4862_s19 = smov [#allocation10]  }
  0xb1   : > { %p4664_p10 = scmp.ne.s32.totalorder %s714_s7, %s4663_s15  ;;  %s4668_s12 = sshll.u32 %s4862_s19, 4  ;;  %s4669_s12 = int_to_ptr.vmem [resolvable:$false] %s4668_s12 }
  0xb2   : > { %s4670_s25 = scalar_lea.vmem %s4669_s12, 128  ;;  %p4671_p1 = scmp.lt.s32.totalorder %s714_s7, %s4669_s12 }
  0xb3   : > { %p4666_p0 = pnand %p4664_p10, %p4624_p9  ;;  %p4672_p11 = scmp.lt.s32.totalorder %s4670_s25, %s4663_s15 }
  0xb5   : > { %s711_s9 = scalar_lea.hbm %s5584_s5, %s3483_s26  ;;  %p4667_p12 = pneg %p4666_p0 }
  0xb6   : > { %p4673_p6 = por %p4672_p11, %p4671_p1 }
  0xb8   : > { %p4674_p7 = pnand %p4673_p6, %p4667_p12 }
  0xba   : > { %4677 = shalt.err (!%p4674_p7)
}
  0xbb   : > { %3910 = dma.hbm_to_vmem [thread:$0]  (!%p5204_p5), %s711_s9, 64, %s714_s7, %s5108_s14  }
  0xbc   : > { %722 = sbr.rel (%p5036_p3) target bundleno = 2701 (0xa8d), region = 96  ;;  %s5234_s11 = sand.u32 (!%p5036_p3), 1, %s4824_s2  }
  0xbd   : > { %s3485_s1 = sshll.u32 (!%p5036_p3), %s5234_s11, 4  ;;  %s725_s17 = scalar_lea.sflag (!%p5036_p3), [#allocation6], %s5234_s11 }
  0xbe   : > { %s5238_s12 = scalar_lea.vmem (!%p5036_p3), [#allocation5], %s3485_s1 }
  0xc1   : > { %4775 = dma.done.wait (%p5172_p2), %s725_s17, 256  }
  0xc2   : > { %4777 = vsyncadd (%p5172_p2), %s725_s17, 4294967040  ;;  %s733_s30 = sand.u32 1, %s5031_s29   ;;  %s735_s14 = sand.u32 1, %s4812_s22  }
  0xc3   : > { %s5246_s13 = sshll.u32 %s735_s14, 4  ;;  %s734_s18 = scalar_lea.sflag [#allocation9], %s733_s30 }
  0xc4   : > { %s737_s8 = scalar_lea.vmem [#allocation8], %s5246_s13 }
  0xc5   : > { %4779 = dma.done.wait (%p5093_p13), %s734_s18, 256  }
  0xc6   : > { %4781 = vsyncadd (%p5093_p13), %s734_s18, 4294967040  ;;  %s3487_s7 = sshll.u32 %s5234_s11, 2 }
  0xc7   : > { %s5254_s16 = scalar_lea.vmem [#allocation10], %s3487_s7 }
  0xc8   : > { %4783 = dma.done.wait (%p5172_p2), %s734_s18, 64  }
  0xc9   : > { %4785 = vsyncadd (%p5172_p2), %s734_s18, 4294967232  ;;  %p5585_p3 = scmp.eq.s32.totalorder %s5031_s29, 0 }
  0xcb   : > { %4787 = dma.done.wait (%p5585_p3), [#allocation12], 8192   ;;  %p5586_p5 = pmov %p5585_p3 }
  0xcc   : > { %p5587_p9 = pmov %p5585_p3 }
  0xcd   : > { %4789 = vsyncadd (%p5586_p5), [#allocation12], 4294959104 }
  0xce   : > { %4791 = dma.done.wait (%p5587_p9), [#allocation15], 8192   ;;  %p5588_p13 = pmov %p5585_p3 }
  0xcf   : > { %p5589_p10 = pmov %p5585_p3 }
  0xd0   : > { %4793 = vsyncadd (%p5588_p13), [#allocation15], 4294959104 }
  0xd1   : > { %4795 = dma.done.wait (%p5589_p10), [#allocation18], 16384   ;;  %p5590_p0 = pmov %p5585_p3 }
  0xd2   : > { %s3495_s0 = sshll.u32 %s5234_s11, 3  ;;  %s5273_s20 = scalar_lea.vmem [#allocation20], %s3485_s1 }
  0xd3   : > { %4797 = vsyncadd (%p5590_p0), [#allocation18], 4294950912  ;;  %s5275_s26 = scalar_lea.vmem [#allocation21], %s3495_s0  ;;  %p3496_p2 = scmp.ne.s32.totalorder %s4832_s3, 0 }
  0xd4   : > { %s5591_s21 = sld [smem:[#allocation44_spill]] (!%p3496_p2) }
  0xd5   : > { %846 = sbr.rel (%p3496_p2) target bundleno = 488 (0x1e8), region = 136  ;;  %s5592_s15 = sld [smem:[#allocation46_spill]] (!%p3496_p2) }
  0xda   : > { %v4035_v0 = vld [vmem:[#allocation13 + $0x74] ss:$8 sps:$4 sm:$0xff]   ;;  %v4039_v2 = vld [vmem:[#allocation13 + $0x70] ss:$8 sps:$4 sm:$0xff]   ;;  %v4041_v4 = vld [vmem:[#allocation13 + $0x64] ss:$8 sps:$4 sm:$0xff]  }
  0xdb   : > { %v4037_v1 = vld [vmem:[#allocation14 + $0x74] ss:$8 sps:$4 sm:$0xff]   ;;  %1063 = vmatprep.subr.bf16.mxu0 %v4035_v0  ;;  %v4040_v3 = vld [vmem:[#allocation14 + $0x70] ss:$8 sps:$4 sm:$0xff]   ;;  %v4043_v5 = vld [vmem:[#allocation14 + $0x64] ss:$8 sps:$4 sm:$0xff]  }
  0xdc   : > { %1310 = vmatprep.subr.bf16.mxu1 %v4037_v1  ;;  %1064 = vmatpush1.bf16.msra.mxu0 %v4039_v2  ;;  %v4045_v6 = vld [vmem:[#allocation13 + $0x60] ss:$8 sps:$4 sm:$0xff]   ;;  %v4047_v8 = vld [vmem:[#allocation13 + $0x54] ss:$8 sps:$4 sm:$0xff]   ;;  %v4051_v10 = vld [vmem:[#allocation13 + $0x50] ss:$8 sps:$4 sm:$0xff]   ;;  %v883_v2 = vlaneseq }
  0xdd   : > { %1311 = vmatpush1.bf16.msra.mxu1 %v4040_v3  ;;  %1065 = vmatprep.subr.bf16.mxu0 %v4041_v4  ;;  %v4046_v7 = vld [vmem:[#allocation14 + $0x60] ss:$8 sps:$4 sm:$0xff]   ;;  %v4049_v9 = vld [vmem:[#allocation14 + $0x54] ss:$8 sps:$4 sm:$0xff]   ;;  %v4052_v11 = vld [vmem:[#allocation14 + $0x50] ss:$8 sps:$4 sm:$0xff]  }
  0xde   : > { %1312 = vmatprep.subr.bf16.mxu1 %v4043_v5  ;;  %v4053_v12 = vld [vmem:[#allocation13 + $0x44] ss:$8 sps:$4 sm:$0xff]   ;;  %v4057_v14 = vld [vmem:[#allocation13 + $0x40] ss:$8 sps:$4 sm:$0xff]   ;;  %v4059_v16 = vld [vmem:[#allocation13 + $0x34] ss:$8 sps:$4 sm:$0xff]  }
  0xdf   : > { %v4055_v13 = vld [vmem:[#allocation14 + $0x44] ss:$8 sps:$4 sm:$0xff]   ;;  %v4058_v15 = vld [vmem:[#allocation14 + $0x40] ss:$8 sps:$4 sm:$0xff]   ;;  %v4061_v17 = vld [vmem:[#allocation14 + $0x34] ss:$8 sps:$4 sm:$0xff]  }
  0xe0   : > { %1066 = vmatpush1.bf16.msra.mxu0 %v4045_v6  ;;  %v4063_v18 = vld [vmem:[#allocation13 + $0x30] ss:$8 sps:$4 sm:$0xff]   ;;  %v4065_v20 = vld [vmem:[#allocation13 + $0x24] ss:$8 sps:$4 sm:$0xff]   ;;  %v4069_v22 = vld [vmem:[#allocation13 + $0x20] ss:$8 sps:$4 sm:$0xff]  }
  0xe1   : > { %1313 = vmatpush1.bf16.msra.mxu1 %v4046_v7  ;;  %1067 = vmatprep.subr.bf16.mxu0 %v4047_v8  ;;  %v4064_v19 = vld [vmem:[#allocation14 + $0x30] ss:$8 sps:$4 sm:$0xff]   ;;  %v4067_v21 = vld [vmem:[#allocation14 + $0x24] ss:$8 sps:$4 sm:$0xff]   ;;  %v4070_v23 = vld [vmem:[#allocation14 + $0x20] ss:$8 sps:$4 sm:$0xff]  }
  0xe2   : > { %1314 = vmatprep.subr.bf16.mxu1 %v4049_v9  ;;  %v4071_v24 = vld [vmem:[#allocation13 + $0x14] ss:$8 sps:$4 sm:$0xff]   ;;  %v4075_v26 = vld [vmem:[#allocation13 + $0x10] ss:$8 sps:$4 sm:$0xff]   ;;  %v4077_v28 = vld [vmem:[#allocation13 + $0x4] ss:$8 sps:$4 sm:$0xff]  }
  0xe3   : > { %v4073_v25 = vld [vmem:[#allocation14 + $0x14] ss:$8 sps:$4 sm:$0xff]   ;;  %v4076_v27 = vld [vmem:[#allocation14 + $0x10] ss:$8 sps:$4 sm:$0xff]   ;;  %v4079_v29 = vld [vmem:[#allocation14 + $0x4] ss:$8 sps:$4 sm:$0xff]  }
  0xe4   : > { %1068 = vmatpush1.bf16.msra.mxu0 %v4051_v10  ;;  %v4081_v30 = vld [vmem:[#allocation13] ss:$8 sps:$4 sm:$0xff]   ;;  %v4083_v32 = vld [vmem:[#allocation13 + $0xf4] ss:$8 sps:$4 sm:$0xff]   ;;  %v4087_v34 = vld [vmem:[#allocation13 + $0xf0] ss:$8 sps:$4 sm:$0xff]  }
  0xe5   : > { %1315 = vmatpush1.bf16.msra.mxu1 %v4052_v11  ;;  %1069 = vmatprep.subr.bf16.mxu0 %v4053_v12  ;;  %v4082_v31 = vld [vmem:[#allocation14] ss:$8 sps:$4 sm:$0xff]   ;;  %v4085_v33 = vld [vmem:[#allocation14 + $0xf4] ss:$8 sps:$4 sm:$0xff]   ;;  %v4088_v35 = vld [vmem:[#allocation14 + $0xf0] ss:$8 sps:$4 sm:$0xff]  }
  0xe6   : > { %1316 = vmatprep.subr.bf16.mxu1 %v4055_v13  ;;  %v4089_v36 = vld [vmem:[#allocation13 + $0xe4] ss:$8 sps:$4 sm:$0xff]   ;;  %v4093_v38 = vld [vmem:[#allocation13 + $0xe0] ss:$8 sps:$4 sm:$0xff]   ;;  %v4095_v40 = vld [vmem:[#allocation13 + $0xd4] ss:$8 sps:$4 sm:$0xff]  }
  0xe7   : > { %v4091_v37 = vld [vmem:[#allocation14 + $0xe4] ss:$8 sps:$4 sm:$0xff]   ;;  %v4094_v39 = vld [vmem:[#allocation14 + $0xe0] ss:$8 sps:$4 sm:$0xff]   ;;  %v4097_v41 = vld [vmem:[#allocation14 + $0xd4] ss:$8 sps:$4 sm:$0xff]  }
  0xe8   : > { %1070 = vmatpush1.bf16.msra.mxu0 %v4057_v14  ;;  %v4099_v42 = vld [vmem:[#allocation13 + $0xd0] ss:$8 sps:$4 sm:$0xff]   ;;  %v4101_v44 = vld [vmem:[#allocation13 + $0xc4] ss:$8 sps:$4 sm:$0xff]   ;;  %v4105_v47 = vld [vmem:[#allocation13 + $0xc0] ss:$8 sps:$4 sm:$0xff]  }
  0xe9   : > { %1317 = vmatpush1.bf16.msra.mxu1 %v4058_v15  ;;  %1071 = vmatprep.subr.bf16.mxu0 %v4059_v16  ;;  %v4100_v43 = vld [vmem:[#allocation14 + $0xd0] ss:$8 sps:$4 sm:$0xff]   ;;  %v4103_v45 = vld [vmem:[#allocation14 + $0xc4] ss:$8 sps:$4 sm:$0xff]   ;;  %v4106_v48 = vld [vmem:[#allocation14 + $0xc0] ss:$8 sps:$4 sm:$0xff]  }
  0xea   : > { %1318 = vmatprep.subr.bf16.mxu1 %v4061_v17  ;;  %v4133_v46 = vld [vmem:[%s737_s8 + $0x4] ss:$8 sps:$4 sm:$0xff]   ;;  %v4111_v51 = vld [vmem:[#allocation13 + $0xb0] ss:$8 sps:$4 sm:$0xff]   ;;  %v4117_v55 = vld [vmem:[#allocation13 + $0xa0] ss:$8 sps:$4 sm:$0xff]  }
  0xeb   : > { %v4107_v49 = vld [vmem:[#allocation13 + $0xb4] ss:$8 sps:$4 sm:$0xff]   ;;  %1095 = vmatprep.mubr.bf16.mxu0 %v4133_v46  ;;  %1342 = vmatprep.mubr.bf16.mxu1 %v4133_v46  ;;  %v4112_v52 = vld [vmem:[#allocation14 + $0xb0] ss:$8 sps:$4 sm:$0xff]   ;;  %v4113_v53 = vld [vmem:[#allocation13 + $0xa4] ss:$8 sps:$4 sm:$0xff]  }
  0xec   : > { %1072 = vmatpush1.bf16.msra.mxu0 %v4063_v18  ;;  %v4109_v50 = vld [vmem:[#allocation14 + $0xb4] ss:$8 sps:$4 sm:$0xff]   ;;  %v4115_v54 = vld [vmem:[#allocation14 + $0xa4] ss:$8 sps:$4 sm:$0xff]   ;;  %v4118_v56 = vld [vmem:[#allocation14 + $0xa0] ss:$8 sps:$4 sm:$0xff]  }
  0xed   : > { %1319 = vmatpush1.bf16.msra.mxu1 %v4064_v19  ;;  %1073 = vmatprep.subr.bf16.mxu0 %v4065_v20  ;;  %v4119_v57 = vld [vmem:[#allocation13 + $0x94] ss:$8 sps:$4 sm:$0xff]   ;;  %v4123_v59 = vld [vmem:[#allocation13 + $0x90] ss:$8 sps:$4 sm:$0xff]   ;;  %v4125_v61 = vld [vmem:[#allocation13 + $0x84] ss:$8 sps:$4 sm:$0xff]  }
  0xee   : > { %1320 = vmatprep.subr.bf16.mxu1 %v4067_v21  ;;  %v4121_v58 = vld [vmem:[#allocation14 + $0x94] ss:$8 sps:$4 sm:$0xff]   ;;  %v4124_v60 = vld [vmem:[#allocation14 + $0x90] ss:$8 sps:$4 sm:$0xff]   ;;  %v4127_v62 = vld [vmem:[#allocation14 + $0x84] ss:$8 sps:$4 sm:$0xff]  }
  0xef   : > { %v4129_v63 = vld [vmem:[#allocation13 + $0x80] ss:$8 sps:$4 sm:$0xff]   ;;  %v884_v3 = vshrl.u32 %v883_v2, 7  ;;  %v881_v5 = vld [vmem:[%s5591_s21] sm:$0x3] }
  0xf0   : > { %1074 = vmatpush1.bf16.msra.mxu0 %v4069_v22  ;;  %v4130_v0 = vld [vmem:[#allocation14 + $0x80] ss:$8 sps:$4 sm:$0xff]   ;;  %v1138_v6 = vld [vmem:[%s5592_s15] sm:$0x3] }
  0xf1   : > { %1321 = vmatpush1.bf16.msra.mxu1 %v4070_v23  ;;  %1075 = vmatprep.subr.bf16.mxu0 %v4071_v24  ;;  %v4131_v1 = vld [vmem:[%s737_s8] ss:$8 sps:$4 sm:$0xff]   ;;  %v885_v4 = vsub.s32 0, %v884_v3  ;;  %v889_v7 = vsub.s32 1, %v884_v3 }
  0xf2   : > { %1322 = vmatprep.subr.bf16.mxu1 %v4073_v25 }
  0xf3   : > { %v886_v10 = vrot.slane %v881_v5, %v885_v4  ;;  %v1143_v11 = vrot.slane %v1138_v6, %v885_v4  ;;  %v890_v12 = vrot.slane %v881_v5, %v889_v7  ;;  %v1147_v14 = vrot.slane %v1138_v6, %v889_v7 }
  0xf4   : > { %1076 = vmatpush1.bf16.msra.mxu0 %v4075_v26 }
  0xf5   : > { %1323 = vmatpush1.bf16.msra.mxu1 %v4076_v27  ;;  %1077 = vmatprep.subr.bf16.mxu0 %v4077_v28 }
  0xf6   : > { %1324 = vmatprep.subr.bf16.mxu1 %v4079_v29 }
  0xf8   : > { %1078 = vmatpush1.bf16.msra.mxu0 %v4081_v30 }
  0xf9   : > { %1325 = vmatpush1.bf16.msra.mxu1 %v4082_v31  ;;  %1079 = vmatprep.subr.bf16.mxu0 %v4083_v32 }
  0xfa   : > { %1326 = vmatprep.subr.bf16.mxu1 %v4085_v33 }
  0xfc   : > { %1080 = vmatpush2.bf16.msra.mxu0 %v4087_v34 }
  0xfd   : > { %1327 = vmatpush2.bf16.msra.mxu1 %v4088_v35  ;;  %1081 = vmatprep.subr.bf16.mxu0 %v4089_v36 }
  0xfe   : > { %1328 = vmatprep.subr.bf16.mxu1 %v4091_v37 }
 0x100   : > { %1082 = vmatpush2.bf16.msra.mxu0 %v4093_v38 }
 0x101   : > { %1329 = vmatpush2.bf16.msra.mxu1 %v4094_v39  ;;  %1083 = vmatprep.subr.bf16.mxu0 %v4095_v40 }
 0x102   : > { %1330 = vmatprep.subr.bf16.mxu1 %v4097_v41 }
 0x104   : > { %1084 = vmatpush2.bf16.msra.mxu0 %v4099_v42 }
 0x105   : > { %1331 = vmatpush2.bf16.msra.mxu1 %v4100_v43  ;;  %1085 = vmatprep.subr.bf16.mxu0 %v4101_v44 }
 0x106   : > { %1332 = vmatprep.subr.bf16.mxu1 %v4103_v45 }
 0x108   : > { %1086 = vmatpush2.bf16.msra.mxu0 %v4105_v47 }
 0x109   : > { %1333 = vmatpush2.bf16.msra.mxu1 %v4106_v48  ;;  %1087 = vmatprep.subr.bf16.mxu0 %v4107_v49 }
 0x10a   : > { %1334 = vmatprep.subr.bf16.mxu1 %v4109_v50 }
 0x10c   : > { %1088 = vmatpush2.bf16.msra.mxu0 %v4111_v51 }
 0x10d   : > { %1335 = vmatpush2.bf16.msra.mxu1 %v4112_v52  ;;  %1089 = vmatprep.subr.bf16.mxu0 %v4113_v53 }
 0x10e   : > { %1336 = vmatprep.subr.bf16.mxu1 %v4115_v54 }
 0x110   : > { %1090 = vmatpush2.bf16.msra.mxu0 %v4117_v55 }
 0x111   : > { %1337 = vmatpush2.bf16.msra.mxu1 %v4118_v56  ;;  %1091 = vmatprep.subr.bf16.mxu0 %v4119_v57 }
 0x112   : > { %1338 = vmatprep.subr.bf16.mxu1 %v4121_v58 }
 0x114   : > { %1092 = vmatpush2.bf16.msra.mxu0 %v4123_v59 }
 0x115   : > { %1339 = vmatpush2.bf16.msra.mxu1 %v4124_v60  ;;  %1093 = vmatprep.subr.bf16.mxu0 %v4125_v61 }
 0x116   : > { %1340 = vmatprep.subr.bf16.mxu1 %v4127_v62 }
 0x118   : > { %1094 = vmatpush2.bf16.msra.mxu0 %v4129_v63 }
 0x119   : > { %1341 = vmatpush2.bf16.msra.mxu1 %v4130_v0 }
 0x11b   : > { %1096 = vmatmul.mubr.bf16.vlgmr.msra.gmra.mxu0 %v4131_v1 }
 0x11c   : > { %1343 = vmatmul.mubr.bf16.vlgmr.msra.gmra.mxu1 %v4131_v1 }
 0x1db   : > { %v1097_v8 = vpop.f32.mrf.mxu0 }
 0x1dc   : > { %v1344_v9 = vpop.f32.mrf.mxu1  ;;  %v1098_v18 = vadd.f32 %v1097_v8, %v886_v10 }
 0x1dd   : > { %v1099_v13 = vpop.f32.mrf.mxu0  ;;  %v1345_v19 = vadd.f32 %v1344_v9, %v1143_v11 }
 0x1de   : > { %v1346_v15 = vpop.f32.mrf.mxu1  ;;  %v1100_v22 = vadd.f32 %v1099_v13, %v890_v12 }
 0x1df   : > { %v1101_v16 = vpop.f32.mrf.mxu0  ;;  %v1347_v23 = vadd.f32 %v1346_v15, %v1147_v14 }
 0x1e0   : > { %v1348_v17 = vpop.f32.mrf.mxu1  ;;  %v1102_v20 = vadd.f32 %v1101_v16, %v886_v10 }
 0x1e1   : > { %v1349_v21 = vadd.f32 %v1348_v17, %v1143_v11  ;;  %v1103_v24 = vpop.f32.mrf.mxu0 }
 0x1e2   : > { %v1350_v25 = vpop.f32.mrf.mxu1  ;;  %v3792_v26 = vpack.c.bf16 %v1102_v20, %v1098_v18  ;;  %v1104_v28 = vadd.f32 %v1103_v24, %v890_v12 }
 0x1e3   : > { %v3797_v27 = vpack.c.bf16 %v1349_v21, %v1345_v19  ;;  %v1351_v29 = vadd.f32 %v1350_v25, %v1147_v14 }
 0x1e4   : > { %3793 = vst [vmem:[#allocation2] sm:$0xff] %v3792_v26   ;;  %v3802_v30 = vpack.c.bf16 %v1104_v28, %v1100_v22 }
 0x1e5   : > { %3798 = vst [vmem:[#allocation3] sm:$0xff] %v3797_v27   ;;  %v3807_v31 = vpack.c.bf16 %v1351_v29, %v1347_v23 }
 0x1e6   : > { %3803 = vst [vmem:[#allocation2 + $0x8] sm:$0xff] %v3802_v30  }
 0x1e7   : > { %3808 = vst [vmem:[#allocation3 + $0x8] sm:$0xff] %v3807_v31  }
 0x1e8 PF: > { %v4134_v32 = vld [vmem:[#allocation11 + $0x74] ss:$8 sps:$4 sm:$0xff]   ;;  %v4136_v33 = vld [vmem:[#allocation11 + $0x70] ss:$8 sps:$4 sm:$0xff]   ;;  %v4863_v34 = vmov 0.0   ;;  %vm4864_vm0 = vmmov 0   ;;  %v1433_v6 = vlaneseq }
 0x1e9   : > { %3836 = vmatprep.subr.bf16.mxu1 %v4863_v34  ;;  %1603 = vmatprep.subr.bf16.mxu0 %v4134_v32  ;;  %v4137_v35 = vld [vmem:[#allocation11 + $0x64] ss:$8 sps:$4 sm:$0xff]   ;;  %v4139_v36 = vld [vmem:[#allocation11 + $0x60] ss:$8 sps:$4 sm:$0xff]   ;;  %v4140_v37 = vld [vmem:[#allocation11 + $0x54] ss:$8 sps:$4 sm:$0xff]  }
 0x1ea   : > { %1604 = vmatpush1.bf16.msra.mxu0 %v4136_v33  ;;  %v4142_v38 = vld [vmem:[#allocation11 + $0x50] ss:$8 sps:$4 sm:$0xff]   ;;  %v4143_v39 = vld [vmem:[#allocation11 + $0x44] ss:$8 sps:$4 sm:$0xff]   ;;  %v4145_v40 = vld [vmem:[#allocation11 + $0x40] ss:$8 sps:$4 sm:$0xff]   ;;  %3838 = vmatprep.mubr.msk.bf16.mxu1 %vm4864_vm0, %v4863_v34 }
 0x1eb   : > { %1605 = vmatprep.subr.bf16.mxu0 %v4137_v35  ;;  %v4146_v41 = vld [vmem:[#allocation11 + $0x34] ss:$8 sps:$4 sm:$0xff]   ;;  %v4148_v42 = vld [vmem:[#allocation11 + $0x30] ss:$8 sps:$4 sm:$0xff]   ;;  %v4149_v43 = vld [vmem:[#allocation11 + $0x24] ss:$8 sps:$4 sm:$0xff]  }
 0x1ec   : > { %v4151_v44 = vld [vmem:[#allocation11 + $0x20] ss:$8 sps:$4 sm:$0xff]   ;;  %v4152_v45 = vld [vmem:[#allocation11 + $0x14] ss:$8 sps:$4 sm:$0xff]   ;;  %v4154_v47 = vld [vmem:[#allocation11 + $0x10] ss:$8 sps:$4 sm:$0xff]  }
 0x1ed   : > { %v5290_v46 = vld [vmem:[%s5238_s12 + $0x8] sm:$0xff]  ;;  %v5295_v3 = vld [vmem:[%s5238_s12] sm:$0xff]  ;;  %v5305_v7 = vshrl.u32 %v1433_v6, 7  ;;  %s5593_s1 = sld [smem:[#allocation42_spill]]  ;;  %vm1744_vm1 = vcmask 130048   ;;  %vm1769_vm2 = vcmask 125952  }
 0x1ee   : > { %1606 = vmatpush1.bf16.msra.mxu0 %v4139_v36  ;;  %v1398_v48 = vpack.c.bf16 %v5290_v46, %v5290_v46  ;;  %v4155_v49 = vld [vmem:[#allocation11 + $0x4] ss:$8 sps:$4 sm:$0xff]   ;;  %v4157_v50 = vld [vmem:[#allocation11] ss:$8 sps:$4 sm:$0xff]   ;;  %v4158_v51 = vld [vmem:[#allocation11 + $0xf4] ss:$8 sps:$4 sm:$0xff]   ;;  %v1397_v5 = vpack.c.bf16 %v5295_v3, %v5295_v3 }
 0x1ef   : > { %1607 = vmatprep.subr.bf16.mxu0 %v4140_v37  ;;  %v4160_v52 = vld [vmem:[#allocation11 + $0xf0] ss:$8 sps:$4 sm:$0xff]   ;;  %v4161_v53 = vld [vmem:[#allocation11 + $0xe4] ss:$8 sps:$4 sm:$0xff]   ;;  %v4163_v54 = vld [vmem:[#allocation11 + $0xe0] ss:$8 sps:$4 sm:$0xff]  }
 0x1f0   : > { %1635 = vmatprep.mubr.bf16.mxu0 %v1398_v48  ;;  %v4164_v55 = vld [vmem:[#allocation11 + $0xd4] ss:$8 sps:$4 sm:$0xff]   ;;  %v4166_v56 = vld [vmem:[#allocation11 + $0xd0] ss:$8 sps:$4 sm:$0xff]   ;;  %v4167_v57 = vld [vmem:[#allocation11 + $0xc4] ss:$8 sps:$4 sm:$0xff]  }
 0x1f1   : > { %v4169_v58 = vld [vmem:[#allocation11 + $0xc0] ss:$8 sps:$4 sm:$0xff]   ;;  %v4170_v59 = vld [vmem:[#allocation11 + $0xb4] ss:$8 sps:$4 sm:$0xff]   ;;  %v4172_v60 = vld [vmem:[#allocation11 + $0xb0] ss:$8 sps:$4 sm:$0xff]  }
 0x1f2   : > { %1608 = vmatpush1.bf16.msra.mxu0 %v4142_v38  ;;  %v4173_v61 = vld [vmem:[#allocation11 + $0xa4] ss:$8 sps:$4 sm:$0xff]   ;;  %v4175_v62 = vld [vmem:[#allocation11 + $0xa0] ss:$8 sps:$4 sm:$0xff]   ;;  %v4176_v63 = vld [vmem:[#allocation11 + $0x94] ss:$8 sps:$4 sm:$0xff]  }
 0x1f3   : > { %1609 = vmatprep.subr.bf16.mxu0 %v4143_v39  ;;  %v4178_v0 = vld [vmem:[#allocation11 + $0x90] ss:$8 sps:$4 sm:$0xff]   ;;  %v4179_v1 = vld [vmem:[#allocation11 + $0x84] ss:$8 sps:$4 sm:$0xff]   ;;  %v4181_v2 = vld [vmem:[#allocation11 + $0x80] ss:$8 sps:$4 sm:$0xff]  }
 0x1f4   : > { %v4182_v4 = vld [vmem:[#allocation2] sm:$0xff]   ;;  %v5308_v8 = vsub.s32 0, %v5305_v7  ;;  %v5315_v11 = vsub.s32 1, %v5305_v7  ;;  %v4183_v15 = vld [vmem:[#allocation2 + $0x8] sm:$0xff]   ;;  %v4184_v48 = vld [vmem:[#allocation3] sm:$0xff]   ;;  %s5594_s30 = sld [smem:[#allocation48_spill]] }
 0x1f5   : > { %v1431_v9 = vld [vmem:[%s5593_s1] sm:$0x3]  ;;  %3837 = vmatpush3.bf16.msra.mxu1 %v4184_v48  ;;  %v4206_v6 = vld [vmem:[#allocation16 + $0x14] ss:$8 sps:$4 sm:$0xff]   ;;  %s5595_s18 = sld [smem:[#allocation49_spill]]  ;;  %s3238_s13 = sshll.u32 %s5275_s26, 4  ;;  %s5399_s13 = int_to_ptr.vmem [resolvable:$true] %s3238_s13 }
 0x1f6   : > { %1610 = vmatpush1.bf16.msra.mxu0 %v4145_v40  ;;  %v1436_v10 = vrot.slane %v1431_v9, %v5308_v8  ;;  %v1440_v17 = vrot.slane %v1431_v9, %v5315_v11  ;;  %v1650_v22 = vld [vmem:[%s5254_s16] sm:$0xf]  ;;  %3842 = vmatprep.subr.bf16.mxu1 %v4863_v34  ;;  %s5596_s16 = sld [smem:[#allocation50_spill]]  ;;  %s4678_s8 = scalar_lea.vmem %s5399_s13, 128 }
 0x1f7   : > { %1611 = vmatprep.subr.bf16.mxu0 %v4146_v41  ;;  %v1651_v23 = vunpack.c.l.bf16 %v1650_v22  ;;  %v4204_v9 = vld [vmem:[#allocation16 + $0x10] ss:$8 sps:$4 sm:$0xff]   ;;  %s5597_s6 = sld [smem:[#allocation52_spill]]  ;;  %p4679_p12 = scmp.ne.s32.totalorder %s5399_s13, %s4678_s8 }
 0x1f8   : > { %v4222_v22 = vld [vmem:[#allocation16 + $0xb0] ss:$8 sps:$4 sm:$0xff]   ;;  %s5598_s9 = sld [smem:[#allocation54_spill]]  ;;  %s4865_s7 = smov [#allocation21]  }
 0x1f9   : > { %s5599_s15 = sld [smem:[#allocation32_spill]]  ;;  %p4680_p1 = pnand %p4679_p12, %p5176_p4 }
 0x1fa   : > { %1612 = vmatpush1.bf16.msra.mxu0 %v4148_v42 }
 0x1fb   : > { %1613 = vmatprep.subr.bf16.mxu0 %v4149_v43  ;;  %p4681_p11 = pneg %p4680_p1 }
 0x1fe   : > { %1614 = vmatpush1.bf16.msra.mxu0 %v4151_v44 }
 0x1ff   : > { %1615 = vmatprep.subr.bf16.mxu0 %v4152_v45  ;;  %s3774_s19 = sshll.u32 %s5599_s15, 2 }
 0x200   : > { %s3235_s25 = sadd.s32 %s4832_s3, %s3774_s19 }
 0x201   : > { %s3777_s1 = sshll.u32 %s3235_s25, 6 }
 0x202   : > { %1616 = vmatpush1.bf16.msra.mxu0 %v4154_v47 }
 0x203   : > { %1617 = vmatprep.subr.bf16.mxu0 %v4155_v49 }
 0x206   : > { %1618 = vmatpush1.bf16.msra.mxu0 %v4157_v50 }
 0x207   : > { %1619 = vmatprep.subr.bf16.mxu0 %v4158_v51 }
 0x20a   : > { %1620 = vmatpush2.bf16.msra.mxu0 %v4160_v52 }
 0x20b   : > { %1621 = vmatprep.subr.bf16.mxu0 %v4161_v53  ;;  %v4185_v53 = vld [vmem:[#allocation3 + $0x8] sm:$0xff]  }
 0x20e   : > { %1622 = vmatpush2.bf16.msra.mxu0 %v4163_v54 }
 0x20f   : > { %1623 = vmatprep.subr.bf16.mxu0 %v4164_v55  ;;  %v4188_v55 = vld [vmem:[#allocation16 + $0x74] ss:$8 sps:$4 sm:$0xff]  }
 0x212   : > { %1624 = vmatpush2.bf16.msra.mxu0 %v4166_v56 }
 0x213   : > { %1625 = vmatprep.subr.bf16.mxu0 %v4167_v57 }
 0x216   : > { %1626 = vmatpush2.bf16.msra.mxu0 %v4169_v58  ;;  %v4186_v58 = vld [vmem:[#allocation16 + $0x70] ss:$8 sps:$4 sm:$0xff]  }
 0x217   : > { %1627 = vmatprep.subr.bf16.mxu0 %v4170_v59 }
 0x21a   : > { %1628 = vmatpush2.bf16.msra.mxu0 %v4172_v60  ;;  %v4191_v60 = vld [vmem:[#allocation16 + $0x64] ss:$8 sps:$4 sm:$0xff]  }
 0x21b   : > { %1629 = vmatprep.subr.bf16.mxu0 %v4173_v61  ;;  %v4189_v61 = vld [vmem:[#allocation16 + $0x60] ss:$8 sps:$4 sm:$0xff]  }
 0x21e   : > { %1630 = vmatpush2.bf16.msra.mxu0 %v4175_v62  ;;  %v4194_v62 = vld [vmem:[#allocation16 + $0x54] ss:$8 sps:$4 sm:$0xff]  }
 0x21f   : > { %1631 = vmatprep.subr.bf16.mxu0 %v4176_v63  ;;  %v4192_v63 = vld [vmem:[#allocation16 + $0x50] ss:$8 sps:$4 sm:$0xff]  }
 0x222   : > { %1632 = vmatpush2.bf16.msra.mxu0 %v4178_v0  ;;  %v4197_v0 = vld [vmem:[#allocation16 + $0x44] ss:$8 sps:$4 sm:$0xff]  }
 0x223   : > { %1633 = vmatprep.subr.bf16.mxu0 %v4179_v1  ;;  %v4195_v1 = vld [vmem:[#allocation16 + $0x40] ss:$8 sps:$4 sm:$0xff]  }
 0x226   : > { %1634 = vmatpush2.bf16.msra.mxu0 %v4181_v2  ;;  %v4198_v2 = vld [vmem:[#allocation16 + $0x30] ss:$8 sps:$4 sm:$0xff]  }
 0x227   : > { %3824 = vmatprep.subr.bf16.mxu0 %v4863_v34 }
 0x229   : > { %1636 = vmatmul.mubr.bf16.vlgmr.msra.gmra.mxu0 %v1397_v5  ;;  %v4201_v5 = vld [vmem:[#allocation16 + $0x20] ss:$8 sps:$4 sm:$0xff]  }
 0x22a   : > { %3825 = vmatpush3.bf16.xpose.msra.mxu0 %v4182_v4  ;;  %3826 = vmatprep.mubr.msk.bf16.mxu0 %vm4864_vm0, %v4863_v34  ;;  %v4203_v4 = vld [vmem:[#allocation16 + $0x24] ss:$8 sps:$4 sm:$0xff]  }
 0x22b   : > { %3830 = vmatprep.subr.bf16.mxu0 %v4863_v34 }
 0x2e9   : > { %v1637_v12 = vpop.f32.mrf.mxu0 }
 0x2ea   : > { %v1638_v13 = vadd.f32 %v1637_v12, %v1436_v10  ;;  %v4209_v10 = vld [vmem:[#allocation16 + $0x4] ss:$8 sps:$4 sm:$0xff]   ;;  %v4207_v12 = vld [vmem:[#allocation16] ss:$8 sps:$4 sm:$0xff]  }
 0x2eb   : > { %v1639_v14 = vpop.f32.mrf.mxu0 }
 0x2ec   : > { %v1644_v16 = vpack.c.bf16 %v1638_v13, %v1638_v13  ;;  %v1640_v20 = vadd.f32 %v1639_v14, %v1440_v17  ;;  %v4212_v13 = vld [vmem:[#allocation16 + $0xf4] ss:$8 sps:$4 sm:$0xff]   ;;  %v4210_v14 = vld [vmem:[#allocation16 + $0xf0] ss:$8 sps:$4 sm:$0xff]  }
 0x2ed   : > { %v1641_v18 = vpop.f32.mrf.mxu0  ;;  %v4218_v17 = vld [vmem:[#allocation16 + $0xd4] ss:$8 sps:$4 sm:$0xff]  }
 0x2ee   : > { %3827 = vmatmul.mubr.bf16.vlgmr.msra.gmra.mxu0 %v1644_v16  ;;  %v1645_v21 = vpack.c.bf16 %v1640_v20, %v1640_v20  ;;  %v4213_v16 = vld [vmem:[#allocation16 + $0xe0] ss:$8 sps:$4 sm:$0xff]   ;;  %v4216_v18 = vld [vmem:[#allocation16 + $0xd0] ss:$8 sps:$4 sm:$0xff]  }
 0x2ef   : > { %3831 = vmatpush3.bf16.xpose.msra.mxu0 %v4183_v15  ;;  %v1642_v19 = vpop.f32.mrf.mxu0  ;;  %3832 = vmatprep.mubr.msk.bf16.mxu0 %vm4864_vm0, %v4863_v34  ;;  %v4215_v15 = vld [vmem:[#allocation16 + $0xe4] ss:$8 sps:$4 sm:$0xff]   ;;  %v4219_v20 = vld [vmem:[#allocation16 + $0xc0] ss:$8 sps:$4 sm:$0xff]  }
 0x2f0   : > { %v4221_v19 = vld [vmem:[#allocation16 + $0xc4] ss:$8 sps:$4 sm:$0xff]  }
 0x2f6   : > { %3833 = vmatmul.mubr.bf16.vlgmr.msra.gmra.mxu0 %v1645_v21  ;;  %v4224_v21 = vld [vmem:[#allocation16 + $0xb4] ss:$8 sps:$4 sm:$0xff]  }
 0x3ae   : > { %v1692_v24 = vpop.f32.mrf.mxu0 }
 0x3af   : > { %v1693_v25 = vadd.f32 %v1692_v24, %v1651_v23  ;;  %v4225_v24 = vld [vmem:[#allocation16 + $0xa0] ss:$8 sps:$4 sm:$0xff]  }
 0x3b0   : > { %v3828_v26 = vpop.f32.mrf.mxu0 }
 0x3b1   : > { %v1745_v27 = vsel %vm1744_vm1, %v1693_v25, -inf  ;;  %v4228_v26 = vld [vmem:[#allocation16 + $0x90] ss:$8 sps:$4 sm:$0xff]  }
 0x3b2   : > { %1746 = vmax.xlane.f32.xlu0 %v1745_v27  ;;  %v1695_v28 = vpop.f32.mrf.mxu0  ;;  %v4233_v27 = vld [vmem:[#allocation16 + $0x84] ss:$8 sps:$4 sm:$0xff]  }
 0x3b3   : > { %v4231_v28 = vld [vmem:[#allocation16 + $0x80] ss:$8 sps:$4 sm:$0xff]  }
 0x3b4   : > { %v3829_v29 = vpop.f32.mrf.mxu0 }
 0x3b6   : > { %v1738_v30 = vpop.f32.mrf.mxu0 }
 0x3b7   : > { %v1739_v31 = vadd.f32 %v1738_v30, %v1651_v23  ;;  %v4227_v23 = vld [vmem:[#allocation16 + $0xa4] ss:$8 sps:$4 sm:$0xff]  }
 0x3b8   : > { %v3834_v32 = vpop.f32.mrf.mxu0 }
 0x3b9   : > { %v1748_v33 = vsel %vm1744_vm1, %v1739_v31, -inf }
 0x3ba   : > { %1749 = vmax.xlane.f32.xlu0 %v1748_v33  ;;  %v1741_v35 = vpop.f32.mrf.mxu0 }
 0x3bc   : > { %v3835_v36 = vpop.f32.mrf.mxu0 }
 0x43b   : > { %v1747_v37 = vpop.xlane.xlu0 %1746 }
 0x43c   : > { %v1751_v38 = vsub.f32 %v1693_v25, %v1747_v37  ;;  %v4230_v25 = vld [vmem:[#allocation16 + $0x94] ss:$8 sps:$4 sm:$0xff]  }
 0x43e   : > { %v1753_v39 = vmul.f32 1.442695, %v1751_v38 }
 0x440   : > { %4426 = vpow2.f32 %v1753_v39 }
 0x443   : > { %v1750_v40 = vpop.xlane.xlu0 %1749 }
 0x444   : > { %v1752_v41 = vsub.f32 %v1739_v31, %v1750_v40  ;;  %v1911_v40 = vld [vmem:[%s5594_s30] sm:$0x3]  ;;  %s5600_s30 = sld [smem:[#allocation58_spill]] }
 0x446   : > { %v1755_v42 = vmul.f32 1.442695, %v1752_v41  ;;  %v1916_v41 = vrot.slane %v1911_v40, %v5308_v8 }
 0x448   : > { %4428 = vpow2.f32 %v1755_v42  ;;  %v1920_v42 = vrot.slane %v1911_v40, %v5315_v11  ;;  %v4294_v40 = vld [vmem:[#allocation17 + $0x1a0] ss:$16 sps:$4 sm:$0xff]  }
 0x44a   : > { %s5396_s14 = scalar_lea.hbm %s5600_s30, %s3777_s1 }
 0x44d   : > { %v4427_v43 = vpop.eup %4426 }
 0x44e   : > { %v1757_v44 = vsel %vm1744_vm1, %v4427_v43, 0.0 }
 0x44f   : > { %1758 = vadd.xlane.f32.xlu1 %v1757_v44 }
 0x455   : > { %v4429_v45 = vpop.eup %4428 }
 0x456   : > { %v1760_v47 = vsel %vm1744_vm1, %v4429_v45, 0.0 }
 0x457   : > { %1761 = vadd.xlane.f32.xlu1 %v1760_v47 }
 0x4d8   : > { %v1759_v49 = vpop.xlane.xlu1 %1758 }
 0x4d9   : > { %4430 = vrcp.f32 %v1759_v49 }
 0x4e0   : > { %v1762_v50 = vpop.xlane.xlu1 %1761 }
 0x4e1   : > { %4432 = vrcp.f32 %v1762_v50 }
 0x4e6   : > { %v4431_v51 = vpop.eup %4430 }
 0x4e7   : > { %v1765_v52 = vmul.f32 %v4431_v51, %v4427_v43 }
 0x4e9   : > { %v1767_v54 = vpack.c.bf16 %v1765_v52, %v1765_v52 }
 0x4eb   : > { %1770 = vst.msk [vmem:[%s5275_s26] sm:$0xf] %vm1769_vm2, %v1767_v54  ;;  %3839 = vmatmul.mubr.msk.bf16.vlgmr.msra.gmra.mxu1 %vm1744_vm1, %v1767_v54  ;;  %v4236_v54 = vld [vmem:[#allocation17 + $0xe4] ss:$16 sps:$4 sm:$0xff]  }
 0x4ec   : > { %3843 = vmatpush3.bf16.msra.mxu1 %v4185_v53  ;;  %3844 = vmatprep.mubr.msk.bf16.mxu1 %vm4864_vm0, %v4863_v34  ;;  %v4200_v34 = vld [vmem:[#allocation16 + $0x34] ss:$8 sps:$4 sm:$0xff]   ;;  %v4234_v53 = vld [vmem:[#allocation17 + $0xe0] ss:$16 sps:$4 sm:$0xff]  }
 0x4ed   : > { %2090 = vmatprep.subr.bf16.mxu1 %v4188_v55  ;;  %v4237_v55 = vld [vmem:[#allocation17 + $0xe8] ss:$16 sps:$4 sm:$0xff]   ;;  %2586 = vmatprep.subr.bf16.mxu0 %v4236_v54 }
 0x4ee   : > { %v4433_v56 = vpop.eup %4432  ;;  %2587 = vmatpush1.bf16.msra.mxu0 %v4234_v53  ;;  %v4312_v53 = vld [vmem:[#allocation17 + $0x140] ss:$16 sps:$4 sm:$0xff]   ;;  %v4315_v54 = vld [vmem:[#allocation17 + $0x148] ss:$16 sps:$4 sm:$0xff]  }
 0x4ef   : > { %v1766_v57 = vmul.f32 %v4433_v56, %v4429_v45  ;;  %v4239_v56 = vld [vmem:[#allocation17 + $0xec] ss:$16 sps:$4 sm:$0xff]  }
 0x4f1   : > { %v1768_v59 = vpack.c.bf16 %v1766_v57, %v1766_v57  ;;  %v4242_v57 = vld [vmem:[#allocation17 + $0xc4] ss:$16 sps:$4 sm:$0xff]  }
 0x4f2   : > { %2588 = vmatprep.subr.bf16.mxu0 %v4242_v57  ;;  %v4318_v57 = vld [vmem:[#allocation17 + $0x120] ss:$16 sps:$4 sm:$0xff]  }
 0x4f3   : > { %1771 = vst.msk [vmem:[%s5275_s26 + $0x4] sm:$0xf] %vm1769_vm2, %v1768_v59  ;;  %3845 = vmatmul.mubr.msk.bf16.vlgmr.msra.gmra.mxu1 %vm1744_vm1, %v1768_v59  ;;  %v4240_v59 = vld [vmem:[#allocation17 + $0xc0] ss:$16 sps:$4 sm:$0xff]  }
 0x4f4   : > { %2091 = vmatpush1.bf16.msra.mxu1 %v4186_v58  ;;  %v4245_v58 = vld [vmem:[#allocation17 + $0xcc] ss:$16 sps:$4 sm:$0xff]   ;;  %2589 = vmatpush1.bf16.msra.mxu0 %v4240_v59  ;;  %v4326_v59 = vld [vmem:[#allocation17 + $0x104] ss:$16 sps:$4 sm:$0xff]  }
 0x4f5   : > { %2092 = vmatprep.subr.bf16.mxu1 %v4191_v60  ;;  %v4251_v60 = vld [vmem:[#allocation17 + $0xac] ss:$16 sps:$4 sm:$0xff]  }
 0x4f8   : > { %2093 = vmatpush1.bf16.msra.mxu1 %v4189_v61  ;;  %v4246_v61 = vld [vmem:[#allocation17 + $0xa0] ss:$16 sps:$4 sm:$0xff]  }
 0x4f9   : > { %2094 = vmatprep.subr.bf16.mxu1 %v4194_v62  ;;  %v4249_v62 = vld [vmem:[#allocation17 + $0xa8] ss:$16 sps:$4 sm:$0xff]  }
 0x4fc   : > { %2095 = vmatpush1.bf16.msra.mxu1 %v4192_v63  ;;  %v4254_v63 = vld [vmem:[#allocation17 + $0x84] ss:$16 sps:$4 sm:$0xff]  }
 0x4fd   : > { %2096 = vmatprep.subr.bf16.mxu1 %v4197_v0  ;;  %v4257_v0 = vld [vmem:[#allocation17 + $0x8c] ss:$16 sps:$4 sm:$0xff]  }
 0x500   : > { %2097 = vmatpush1.bf16.msra.mxu1 %v4195_v1  ;;  %v4252_v1 = vld [vmem:[#allocation17 + $0x80] ss:$16 sps:$4 sm:$0xff]  }
 0x501   : > { %2098 = vmatprep.subr.bf16.mxu1 %v4200_v34  ;;  %v4255_v34 = vld [vmem:[#allocation17 + $0x88] ss:$16 sps:$4 sm:$0xff]  }
 0x504   : > { %2099 = vmatpush1.bf16.msra.mxu1 %v4198_v2  ;;  %v4260_v2 = vld [vmem:[#allocation17 + $0x64] ss:$16 sps:$4 sm:$0xff]  }
 0x505   : > { %2100 = vmatprep.subr.bf16.mxu1 %v4203_v4  ;;  %v4263_v4 = vld [vmem:[#allocation17 + $0x6c] ss:$16 sps:$4 sm:$0xff]  }
 0x508   : > { %2101 = vmatpush1.bf16.msra.mxu1 %v4201_v5  ;;  %v4258_v5 = vld [vmem:[#allocation17 + $0x60] ss:$16 sps:$4 sm:$0xff]  }
 0x509   : > { %2102 = vmatprep.subr.bf16.mxu1 %v4206_v6  ;;  %v4261_v6 = vld [vmem:[#allocation17 + $0x68] ss:$16 sps:$4 sm:$0xff]  }
 0x50c   : > { %2103 = vmatpush1.bf16.msra.mxu1 %v4204_v9  ;;  %v4266_v9 = vld [vmem:[#allocation17 + $0x44] ss:$16 sps:$4 sm:$0xff]  }
 0x50d   : > { %2104 = vmatprep.subr.bf16.mxu1 %v4209_v10  ;;  %v4269_v10 = vld [vmem:[#allocation17 + $0x4c] ss:$16 sps:$4 sm:$0xff]  }
 0x510   : > { %2105 = vmatpush1.bf16.msra.mxu1 %v4207_v12  ;;  %v4264_v12 = vld [vmem:[#allocation17 + $0x40] ss:$16 sps:$4 sm:$0xff]  }
 0x511   : > { %2106 = vmatprep.subr.bf16.mxu1 %v4212_v13  ;;  %v4267_v13 = vld [vmem:[#allocation17 + $0x48] ss:$16 sps:$4 sm:$0xff]  }
 0x514   : > { %2107 = vmatpush2.bf16.msra.mxu1 %v4210_v14  ;;  %v4272_v14 = vld [vmem:[#allocation17 + $0x24] ss:$16 sps:$4 sm:$0xff]  }
 0x515   : > { %2108 = vmatprep.subr.bf16.mxu1 %v4215_v15  ;;  %v4275_v15 = vld [vmem:[#allocation17 + $0x2c] ss:$16 sps:$4 sm:$0xff]  }
 0x518   : > { %2109 = vmatpush2.bf16.msra.mxu1 %v4213_v16  ;;  %v4270_v16 = vld [vmem:[#allocation17 + $0x20] ss:$16 sps:$4 sm:$0xff]  }
 0x519   : > { %2110 = vmatprep.subr.bf16.mxu1 %v4218_v17  ;;  %v4273_v17 = vld [vmem:[#allocation17 + $0x28] ss:$16 sps:$4 sm:$0xff]  }
 0x51c   : > { %2111 = vmatpush2.bf16.msra.mxu1 %v4216_v18  ;;  %v4278_v18 = vld [vmem:[#allocation17 + $0x4] ss:$16 sps:$4 sm:$0xff]  }
 0x51d   : > { %2112 = vmatprep.subr.bf16.mxu1 %v4221_v19  ;;  %v4281_v19 = vld [vmem:[#allocation17 + $0xc] ss:$16 sps:$4 sm:$0xff]  }
 0x520   : > { %2113 = vmatpush2.bf16.msra.mxu1 %v4219_v20  ;;  %v4276_v20 = vld [vmem:[#allocation17] ss:$16 sps:$4 sm:$0xff]  }
 0x521   : > { %2114 = vmatprep.subr.bf16.mxu1 %v4224_v21  ;;  %v4279_v21 = vld [vmem:[#allocation17 + $0x8] ss:$16 sps:$4 sm:$0xff]  }
 0x524   : > { %2115 = vmatpush2.bf16.msra.mxu1 %v4222_v22  ;;  %v4284_v22 = vld [vmem:[#allocation17 + $0x1e4] ss:$16 sps:$4 sm:$0xff]  }
 0x525   : > { %2116 = vmatprep.subr.bf16.mxu1 %v4227_v23  ;;  %v4287_v23 = vld [vmem:[#allocation17 + $0x1ec] ss:$16 sps:$4 sm:$0xff]  }
 0x528   : > { %2117 = vmatpush2.bf16.msra.mxu1 %v4225_v24  ;;  %v4282_v24 = vld [vmem:[#allocation17 + $0x1e0] ss:$16 sps:$4 sm:$0xff]  }
 0x529   : > { %2118 = vmatprep.subr.bf16.mxu1 %v4230_v25  ;;  %v4285_v25 = vld [vmem:[#allocation17 + $0x1e8] ss:$16 sps:$4 sm:$0xff]  }
 0x52c   : > { %2119 = vmatpush2.bf16.msra.mxu1 %v4228_v26  ;;  %v4290_v26 = vld [vmem:[#allocation17 + $0x1c4] ss:$16 sps:$4 sm:$0xff]  }
 0x52d   : > { %2120 = vmatprep.subr.bf16.mxu1 %v4233_v27  ;;  %v4293_v27 = vld [vmem:[#allocation17 + $0x1cc] ss:$16 sps:$4 sm:$0xff]  }
 0x530   : > { %2121 = vmatpush2.bf16.msra.mxu1 %v4231_v28  ;;  %v4288_v28 = vld [vmem:[#allocation17 + $0x1c0] ss:$16 sps:$4 sm:$0xff]  }
 0x531   : > { %2627 = vmatprep.subr.bf16.mxu1 %v4239_v56  ;;  %v4323_v56 = vld [vmem:[#allocation17 + $0x12c] ss:$16 sps:$4 sm:$0xff]  }
 0x5ab   : > { %v1819_v29 = vpop.f32.mrf.mxu1 }
 0x5ac   : > { %v3814_v36 = vpack.c.bf16 %v1819_v29, %v1819_v29  ;;  %v4291_v29 = vld [vmem:[#allocation17 + $0x1c8] ss:$16 sps:$4 sm:$0xff]  }
 0x5ad   : > { %v3840_v30 = vpop.f32.mrf.mxu1 }
 0x5af   : > { %v1822_v31 = vpop.f32.mrf.mxu1 }
 0x5b1   : > { %v3841_v32 = vpop.f32.mrf.mxu1 }
 0x5b3   : > { %v1868_v33 = vpop.f32.mrf.mxu1 }
 0x5b4   : > { %v3815_v35 = vpack.c.bf16 %v1868_v33, %v1868_v33 }
 0x5b5   : > { %v3846_v37 = vpop.f32.mrf.mxu1 }
 0x5b6   : > { %2122 = vmatprep.mubr.bf16.mxu1 %v3815_v35 }
 0x5b7   : > { %v1871_v38 = vpop.f32.mrf.mxu1  ;;  %2123 = vmatmul.mubr.bf16.vlgmr.msra.gmra.mxu1 %v3814_v36 }
 0x5b8   : > { %2628 = vmatpush1.bf16.msra.mxu1 %v4237_v55  ;;  %v4296_v38 = vld [vmem:[#allocation17 + $0x1a4] ss:$16 sps:$4 sm:$0xff]  }
 0x5b9   : > { %v3847_v39 = vpop.f32.mrf.mxu1  ;;  %2629 = vmatprep.subr.bf16.mxu1 %v4245_v58  ;;  %v4320_v55 = vld [vmem:[#allocation17 + $0x124] ss:$16 sps:$4 sm:$0xff]   ;;  %v4321_v58 = vld [vmem:[#allocation17 + $0x128] ss:$16 sps:$4 sm:$0xff]  }
 0x5ba   : > { %v4299_v39 = vld [vmem:[#allocation17 + $0x1ac] ss:$16 sps:$4 sm:$0xff]  }
 0x677   : > { %v2124_v43 = vpop.f32.mrf.mxu1 }
 0x678   : > { %v2125_v44 = vadd.f32 %v2124_v43, %v1916_v41  ;;  %v4297_v41 = vld [vmem:[#allocation17 + $0x1a8] ss:$16 sps:$4 sm:$0xff]   ;;  %v4302_v43 = vld [vmem:[#allocation17 + $0x184] ss:$16 sps:$4 sm:$0xff]  }
 0x679   : > { %v2126_v45 = vpop.f32.mrf.mxu1 }
 0x67a   : > { %v2127_v47 = vadd.f32 %v2126_v45, %v1920_v42  ;;  %v5338_v49 = vadd.f32 %v2125_v44, %v5295_v3  ;;  %v4243_v3 = vld [vmem:[#allocation17 + $0xc8] ss:$16 sps:$4 sm:$0xff]   ;;  %v4300_v42 = vld [vmem:[#allocation17 + $0x180] ss:$16 sps:$4 sm:$0xff]   ;;  %v4305_v45 = vld [vmem:[#allocation17 + $0x18c] ss:$16 sps:$4 sm:$0xff]  }
 0x67b   : > { %v2128_v48 = vpop.f32.mrf.mxu1  ;;  %2630 = vmatpush1.bf16.msra.mxu1 %v4243_v3  ;;  %v4303_v44 = vld [vmem:[#allocation17 + $0x188] ss:$16 sps:$4 sm:$0xff]   ;;  %v4329_v3 = vld [vmem:[#allocation17 + $0x10c] ss:$16 sps:$4 sm:$0xff]  }
 0x67c   : > { %v5341_v50 = vadd.f32 %v2127_v47, %v5290_v46  ;;  %v4248_v46 = vld [vmem:[#allocation17 + $0xa4] ss:$16 sps:$4 sm:$0xff]   ;;  %2631 = vmatprep.subr.bf16.mxu1 %v4251_v60  ;;  %v4311_v48 = vld [vmem:[#allocation17 + $0x16c] ss:$16 sps:$4 sm:$0xff]   ;;  %v4327_v60 = vld [vmem:[#allocation17 + $0x108] ss:$16 sps:$4 sm:$0xff]  }
 0x67d   : > { %v2129_v51 = vpop.f32.mrf.mxu1  ;;  %2590 = vmatprep.subr.bf16.mxu0 %v4248_v46  ;;  %v4308_v47 = vld [vmem:[#allocation17 + $0x164] ss:$16 sps:$4 sm:$0xff]   ;;  %v4324_v46 = vld [vmem:[#allocation17 + $0x100] ss:$16 sps:$4 sm:$0xff]  }
 0x67e   : > { %v2135_v52 = vadd.f32 %v5341_v50, %v5338_v49  ;;  %2591 = vmatpush1.bf16.msra.mxu0 %v4246_v61  ;;  %v4314_v51 = vld [vmem:[#allocation17 + $0x144] ss:$16 sps:$4 sm:$0xff]  }
 0x67f   : > { %2632 = vmatpush1.bf16.msra.mxu1 %v4249_v62  ;;  %2592 = vmatprep.subr.bf16.mxu0 %v4254_v63  ;;  %v4332_v61 = vld [vmem:[#allocation19 + $0x74] ss:$8 sps:$4 sm:$0xff]  }
 0x680   : > { %2136 = vadd.xlane.f32.xlu0 %v2135_v52  ;;  %2633 = vmatprep.subr.bf16.mxu1 %v4257_v0  ;;  %v4317_v52 = vld [vmem:[#allocation17 + $0x14c] ss:$16 sps:$4 sm:$0xff]  }
 0x681   : > { %v4335_v62 = vld [vmem:[#allocation19 + $0x174] ss:$8 sps:$4 sm:$0xff]  }
 0x682   : > { %2593 = vmatpush1.bf16.msra.mxu0 %v4252_v1 }
 0x683   : > { %2634 = vmatpush1.bf16.msra.mxu1 %v4255_v34  ;;  %2594 = vmatprep.subr.bf16.mxu0 %v4260_v2  ;;  %v2133_v34 = vld [vmem:[%s5595_s18] sm:$0x3]  ;;  %s3208_s18 = scalar_lea.sflag [#allocation22], %s5234_s11 }
 0x684   : > { %2635 = vmatprep.subr.bf16.mxu1 %v4263_v4  ;;  %v2134_v2 = vld [vmem:[%s5596_s16] sm:$0x3]  ;;  %v2156_v4 = vrot.slane %v2133_v34, %v5308_v8  ;;  %s4682_s16 = sshll.u32 %s4865_s7, 4  ;;  %s4683_s16 = int_to_ptr.vmem [resolvable:$false] %s4682_s16 }
 0x685   : > { %s4684_s0 = scalar_lea.vmem %s4683_s16, 256  ;;  %p4685_p6 = scmp.lt.s32.totalorder %s5399_s13, %s4683_s16 }
 0x686   : > { %2595 = vmatpush1.bf16.msra.mxu0 %v4258_v5  ;;  %v2160_v5 = vrot.slane %v2133_v34, %v5315_v11  ;;  %v4404_v34 = vld [vmem:[#allocation19 + $0xb4] ss:$8 sps:$4 sm:$0xff]   ;;  %p4686_p7 = scmp.lt.s32.totalorder %s4684_s0, %s4678_s8 }
 0x687   : > { %2636 = vmatpush1.bf16.msra.mxu1 %v4261_v6  ;;  %2596 = vmatprep.subr.bf16.mxu0 %v4266_v9 }
 0x688   : > { %2637 = vmatprep.subr.bf16.mxu1 %v4269_v10  ;;  %v2169_v10 = vrot.slane %v2134_v2, %v5308_v8  ;;  %p4687_p3 = por %p4686_p7, %p4685_p6 }
 0x68a   : > { %2597 = vmatpush1.bf16.msra.mxu0 %v4264_v12  ;;  %v2173_v12 = vrot.slane %v2134_v2, %v5315_v11  ;;  %v4407_v2 = vld [vmem:[#allocation19 + $0x1b4] ss:$8 sps:$4 sm:$0xff]   ;;  %p4688_p5 = pnand %p4687_p3, %p4681_p11 }
 0x68b   : > { %2638 = vmatpush1.bf16.msra.mxu1 %v4267_v13  ;;  %2598 = vmatprep.subr.bf16.mxu0 %v4272_v14 }
 0x68c   : > { %2639 = vmatprep.subr.bf16.mxu1 %v4275_v15 }
 0x68e   : > { %2599 = vmatpush1.bf16.msra.mxu0 %v4270_v16 }
 0x68f   : > { %2640 = vmatpush1.bf16.msra.mxu1 %v4273_v17  ;;  %2600 = vmatprep.subr.bf16.mxu0 %v4278_v18 }
 0x690   : > { %2641 = vmatprep.subr.bf16.mxu1 %v4281_v19 }
 0x692   : > { %2601 = vmatpush1.bf16.msra.mxu0 %v4276_v20  ;;  %v4330_v20 = vld [vmem:[#allocation19 + $0x70] ss:$8 sps:$4 sm:$0xff]  }
 0x693   : > { %2642 = vmatpush1.bf16.msra.mxu1 %v4279_v21  ;;  %2602 = vmatprep.subr.bf16.mxu0 %v4284_v22  ;;  %v4333_v21 = vld [vmem:[#allocation19 + $0x170] ss:$8 sps:$4 sm:$0xff]   ;;  %v4338_v22 = vld [vmem:[#allocation19 + $0x64] ss:$8 sps:$4 sm:$0xff]  }
 0x694   : > { %2643 = vmatprep.subr.bf16.mxu1 %v4287_v23  ;;  %v4341_v23 = vld [vmem:[#allocation19 + $0x164] ss:$8 sps:$4 sm:$0xff]  }
 0x696   : > { %2603 = vmatpush2.bf16.msra.mxu0 %v4282_v24  ;;  %v4336_v24 = vld [vmem:[#allocation19 + $0x60] ss:$8 sps:$4 sm:$0xff]  }
 0x697   : > { %2644 = vmatpush2.bf16.msra.mxu1 %v4285_v25  ;;  %2604 = vmatprep.subr.bf16.mxu0 %v4290_v26  ;;  %v4339_v25 = vld [vmem:[#allocation19 + $0x160] ss:$8 sps:$4 sm:$0xff]   ;;  %v4344_v26 = vld [vmem:[#allocation19 + $0x54] ss:$8 sps:$4 sm:$0xff]  }
 0x698   : > { %2645 = vmatprep.subr.bf16.mxu1 %v4293_v27  ;;  %v4347_v27 = vld [vmem:[#allocation19 + $0x154] ss:$8 sps:$4 sm:$0xff]  }
 0x69a   : > { %2605 = vmatpush2.bf16.msra.mxu0 %v4288_v28  ;;  %v4342_v28 = vld [vmem:[#allocation19 + $0x50] ss:$8 sps:$4 sm:$0xff]  }
 0x69b   : > { %2646 = vmatpush2.bf16.msra.mxu1 %v4291_v29  ;;  %2606 = vmatprep.subr.bf16.mxu0 %v4296_v38  ;;  %v4345_v29 = vld [vmem:[#allocation19 + $0x150] ss:$8 sps:$4 sm:$0xff]  }
 0x69c   : > { %2647 = vmatprep.subr.bf16.mxu1 %v4299_v39  ;;  %v4357_v38 = vld [vmem:[#allocation19 + $0x130] ss:$8 sps:$4 sm:$0xff]   ;;  %v4362_v39 = vld [vmem:[#allocation19 + $0x24] ss:$8 sps:$4 sm:$0xff]  }
 0x69e   : > { %2607 = vmatpush2.bf16.msra.mxu0 %v4294_v40  ;;  %v4365_v40 = vld [vmem:[#allocation19 + $0x124] ss:$8 sps:$4 sm:$0xff]  }
 0x69f   : > { %2648 = vmatpush2.bf16.msra.mxu1 %v4297_v41  ;;  %2608 = vmatprep.subr.bf16.mxu0 %v4302_v43  ;;  %v4360_v41 = vld [vmem:[#allocation19 + $0x20] ss:$8 sps:$4 sm:$0xff]   ;;  %v4368_v43 = vld [vmem:[#allocation19 + $0x14] ss:$8 sps:$4 sm:$0xff]  }
 0x6a0   : > { %2649 = vmatprep.subr.bf16.mxu1 %v4305_v45  ;;  %v4366_v45 = vld [vmem:[#allocation19 + $0x10] ss:$8 sps:$4 sm:$0xff]  }
 0x6a2   : > { %2609 = vmatpush2.bf16.msra.mxu0 %v4300_v42  ;;  %v4363_v42 = vld [vmem:[#allocation19 + $0x120] ss:$8 sps:$4 sm:$0xff]  }
 0x6a3   : > { %2650 = vmatpush2.bf16.msra.mxu1 %v4303_v44  ;;  %2610 = vmatprep.subr.bf16.mxu0 %v4308_v47  ;;  %v4371_v44 = vld [vmem:[#allocation19 + $0x114] ss:$8 sps:$4 sm:$0xff]   ;;  %v4369_v47 = vld [vmem:[#allocation19 + $0x110] ss:$8 sps:$4 sm:$0xff]  }
 0x6a4   : > { %2651 = vmatprep.subr.bf16.mxu1 %v4311_v48  ;;  %v4374_v48 = vld [vmem:[#allocation19 + $0x4] ss:$8 sps:$4 sm:$0xff]  }
 0x709   : > { %v2137_v30 = vpop.xlane.xlu0 %2136 }
 0x70a   : > { %v2139_v31 = vmul.f32 0.00390625, %v2137_v30  ;;  %v4350_v30 = vld [vmem:[#allocation19 + $0x44] ss:$8 sps:$4 sm:$0xff]  }
 0x70c   : > { %v5346_v32 = vsub.f32 %v5338_v49, %v2139_v31  ;;  %v5349_v33 = vsub.f32 %v5341_v50, %v2139_v31  ;;  %v4306_v49 = vld [vmem:[#allocation17 + $0x160] ss:$16 sps:$4 sm:$0xff]   ;;  %v4309_v50 = vld [vmem:[#allocation17 + $0x168] ss:$16 sps:$4 sm:$0xff]   ;;  %v4353_v31 = vld [vmem:[#allocation19 + $0x144] ss:$8 sps:$4 sm:$0xff]  }
 0x70d   : > { %2611 = vmatpush2.bf16.msra.mxu0 %v4306_v49  ;;  %2652 = vmatpush2.bf16.msra.mxu1 %v4309_v50  ;;  %v4377_v49 = vld [vmem:[#allocation19 + $0x104] ss:$8 sps:$4 sm:$0xff]   ;;  %v4372_v50 = vld [vmem:[#allocation19] ss:$8 sps:$4 sm:$0xff]  }
 0x70e   : > { %v2142_v35 = vmul.f32 %v5346_v32, %v5346_v32  ;;  %v2143_v36 = vmul.f32 %v5349_v33, %v5349_v33  ;;  %2612 = vmatprep.subr.bf16.mxu0 %v4314_v51  ;;  %2653 = vmatprep.subr.bf16.mxu1 %v4317_v52  ;;  %v4375_v51 = vld [vmem:[#allocation19 + $0x100] ss:$8 sps:$4 sm:$0xff]   ;;  %v4380_v52 = vld [vmem:[#allocation19 + $0xf4] ss:$8 sps:$4 sm:$0xff]  }
 0x710   : > { %v2144_v37 = vadd.f32 %v2143_v36, %v2142_v35  ;;  %v4356_v35 = vld [vmem:[#allocation19 + $0x34] ss:$8 sps:$4 sm:$0xff]  }
 0x711   : > { %2613 = vmatpush2.bf16.msra.mxu0 %v4312_v53  ;;  %2654 = vmatpush2.bf16.msra.mxu1 %v4315_v54  ;;  %v4359_v36 = vld [vmem:[#allocation19 + $0x134] ss:$8 sps:$4 sm:$0xff]   ;;  %v4378_v54 = vld [vmem:[#allocation19 + $0xf0] ss:$8 sps:$4 sm:$0xff]  }
 0x712   : > { %2145 = vadd.xlane.f32.xlu1 %v2144_v37  ;;  %2614 = vmatprep.subr.bf16.mxu0 %v4320_v55  ;;  %v4354_v37 = vld [vmem:[#allocation19 + $0x30] ss:$8 sps:$4 sm:$0xff]   ;;  %v4383_v53 = vld [vmem:[#allocation19 + $0x1f4] ss:$8 sps:$4 sm:$0xff]  }
 0x713   : > { %2655 = vmatprep.subr.bf16.mxu1 %v4323_v56  ;;  %v4381_v55 = vld [vmem:[#allocation19 + $0x1f0] ss:$8 sps:$4 sm:$0xff]   ;;  %v4386_v56 = vld [vmem:[#allocation19 + $0xe4] ss:$8 sps:$4 sm:$0xff]  }
 0x715   : > { %2615 = vmatpush2.bf16.msra.mxu0 %v4318_v57  ;;  %2656 = vmatpush2.bf16.msra.mxu1 %v4321_v58  ;;  %v4389_v57 = vld [vmem:[#allocation19 + $0x1e4] ss:$8 sps:$4 sm:$0xff]   ;;  %v4384_v58 = vld [vmem:[#allocation19 + $0xe0] ss:$8 sps:$4 sm:$0xff]  }
 0x716   : > { %2616 = vmatprep.subr.bf16.mxu0 %v4326_v59  ;;  %2657 = vmatprep.subr.bf16.mxu1 %v4329_v3  ;;  %v4387_v59 = vld [vmem:[#allocation19 + $0x1e0] ss:$8 sps:$4 sm:$0xff]   ;;  %v4392_v3 = vld [vmem:[#allocation19 + $0xd4] ss:$8 sps:$4 sm:$0xff]  }
 0x719   : > { %2617 = vmatpush2.bf16.msra.mxu0 %v4324_v46  ;;  %2658 = vmatpush2.bf16.msra.mxu1 %v4327_v60  ;;  %v4395_v46 = vld [vmem:[#allocation19 + $0x1d4] ss:$8 sps:$4 sm:$0xff]   ;;  %v4390_v60 = vld [vmem:[#allocation19 + $0xd0] ss:$8 sps:$4 sm:$0xff]  }
 0x71a   : > { %3072 = vmatprep.subr.bf16.mxu0 %v4332_v61  ;;  %3113 = vmatprep.subr.bf16.mxu1 %v4335_v62  ;;  %v4393_v61 = vld [vmem:[#allocation19 + $0x1d0] ss:$8 sps:$4 sm:$0xff]   ;;  %v4398_v62 = vld [vmem:[#allocation19 + $0xc4] ss:$8 sps:$4 sm:$0xff]  }
 0x79b   : > { %v2146_v63 = vpop.xlane.xlu1 %2145 }
 0x79c   : > { %v2147_v0 = vmul.f32 0.00390625, %v2146_v63  ;;  %v4401_v63 = vld [vmem:[#allocation19 + $0x1c4] ss:$8 sps:$4 sm:$0xff]  }
 0x79e   : > { %v2148_v1 = vadd.f32 1e-05, %v2147_v0  ;;  %v4396_v0 = vld [vmem:[#allocation19 + $0xc0] ss:$8 sps:$4 sm:$0xff]  }
 0x7a0   : > { %4434 = vrsqrt.f32 %v2148_v1  ;;  %v4399_v1 = vld [vmem:[#allocation19 + $0x1c0] ss:$8 sps:$4 sm:$0xff]  }
 0x7ad   : > { %v4435_v6 = vpop.eup %4434 }
 0x7ae   : > { %v2151_v9 = vmul.f32 %v4435_v6, %v5349_v33  ;;  %v2150_v13 = vmul.f32 %v4435_v6, %v5346_v32  ;;  %v4348_v32 = vld [vmem:[#allocation19 + $0x40] ss:$8 sps:$4 sm:$0xff]   ;;  %v4410_v6 = vld [vmem:[#allocation19 + $0xa4] ss:$8 sps:$4 sm:$0xff]  }
 0x7af   : > { %v4351_v33 = vld [vmem:[#allocation19 + $0x140] ss:$8 sps:$4 sm:$0xff]  }
 0x7b0   : > { %v2164_v14 = vmul.f32 %v2160_v5, %v2151_v9  ;;  %v2163_v15 = vmul.f32 %v2156_v4, %v2150_v13  ;;  %v4402_v4 = vld [vmem:[#allocation19 + $0xb0] ss:$8 sps:$4 sm:$0xff]   ;;  %v4413_v9 = vld [vmem:[#allocation19 + $0x1a4] ss:$8 sps:$4 sm:$0xff]   ;;  %v4416_v13 = vld [vmem:[#allocation19 + $0x94] ss:$8 sps:$4 sm:$0xff]  }
 0x7b1   : > { %v4405_v5 = vld [vmem:[#allocation19 + $0x1b0] ss:$8 sps:$4 sm:$0xff]  }
 0x7b2   : > { %v5367_v16 = vadd.f32 %v2173_v12, %v2164_v14  ;;  %v5369_v17 = vadd.f32 %v2169_v10, %v2163_v15  ;;  %v4408_v10 = vld [vmem:[#allocation19 + $0xa0] ss:$8 sps:$4 sm:$0xff]   ;;  %v4419_v14 = vld [vmem:[#allocation19 + $0x194] ss:$8 sps:$4 sm:$0xff]   ;;  %v4414_v15 = vld [vmem:[#allocation19 + $0x90] ss:$8 sps:$4 sm:$0xff]  }
 0x7b3   : > { %v4411_v12 = vld [vmem:[#allocation19 + $0x1a0] ss:$8 sps:$4 sm:$0xff]  }
 0x7b4   : > { %v2179_v18 = vpack.c.bf16 %v5367_v16, %v5367_v16  ;;  %v2178_v19 = vpack.c.bf16 %v5369_v17, %v5369_v17 }
 0x7b6   : > { %2618 = vmatprep.mubr.bf16.mxu0 %v2179_v18  ;;  %2659 = vmatprep.mubr.bf16.mxu1 %v2179_v18  ;;  %v4417_v18 = vld [vmem:[#allocation19 + $0x190] ss:$8 sps:$4 sm:$0xff]  }
 0x7b7   : > { %2619 = vmatmul.mubr.bf16.vlgmr.msra.gmra.mxu0 %v2178_v19  ;;  %2660 = vmatmul.mubr.bf16.vlgmr.msra.gmra.mxu1 %v2178_v19  ;;  %v4422_v19 = vld [vmem:[#allocation19 + $0x84] ss:$8 sps:$4 sm:$0xff]  }
 0x7b8   : > { %3073 = vmatpush1.bf16.msra.mxu0 %v4330_v20  ;;  %3114 = vmatpush1.bf16.msra.mxu1 %v4333_v21  ;;  %v4425_v20 = vld [vmem:[#allocation19 + $0x184] ss:$8 sps:$4 sm:$0xff]   ;;  %v4420_v21 = vld [vmem:[#allocation19 + $0x80] ss:$8 sps:$4 sm:$0xff]  }
 0x7b9   : > { %3074 = vmatprep.subr.bf16.mxu0 %v4338_v22  ;;  %3115 = vmatprep.subr.bf16.mxu1 %v4341_v23  ;;  %v4423_v22 = vld [vmem:[#allocation19 + $0x180] ss:$8 sps:$4 sm:$0xff]   ;;  %v2256_v23 = vsub.s32 2, %v5305_v7 }
 0x7bc   : > { %3075 = vmatpush1.bf16.msra.mxu0 %v4336_v24  ;;  %3116 = vmatpush1.bf16.msra.mxu1 %v4339_v25  ;;  %v2244_v24 = vld [vmem:[%s5597_s6] sm:$0xf]  ;;  %v2260_v25 = vsub.s32 3, %v5305_v7 }
 0x7bd   : > { %3076 = vmatprep.subr.bf16.mxu0 %v4344_v26  ;;  %3117 = vmatprep.subr.bf16.mxu1 %v4347_v27  ;;  %v2249_v26 = vrot.slane %v2244_v24, %v5308_v8  ;;  %v2257_v27 = vrot.slane %v2244_v24, %v2256_v23 }
 0x7c0   : > { %3077 = vmatpush1.bf16.msra.mxu0 %v4342_v28  ;;  %3118 = vmatpush1.bf16.msra.mxu1 %v4345_v29  ;;  %v2253_v28 = vrot.slane %v2244_v24, %v5315_v11  ;;  %v2261_v29 = vrot.slane %v2244_v24, %v2260_v25 }
 0x7c1   : > { %3078 = vmatprep.subr.bf16.mxu0 %v4350_v30  ;;  %3119 = vmatprep.subr.bf16.mxu1 %v4353_v31 }
 0x7c4   : > { %3079 = vmatpush1.bf16.msra.mxu0 %v4348_v32  ;;  %3120 = vmatpush1.bf16.msra.mxu1 %v4351_v33 }
 0x7c5   : > { %3080 = vmatprep.subr.bf16.mxu0 %v4356_v35  ;;  %3121 = vmatprep.subr.bf16.mxu1 %v4359_v36 }
 0x7c8   : > { %3081 = vmatpush1.bf16.msra.mxu0 %v4354_v37  ;;  %3122 = vmatpush1.bf16.msra.mxu1 %v4357_v38 }
 0x7c9   : > { %3082 = vmatprep.subr.bf16.mxu0 %v4362_v39  ;;  %3123 = vmatprep.subr.bf16.mxu1 %v4365_v40 }
 0x7cc   : > { %3083 = vmatpush1.bf16.msra.mxu0 %v4360_v41  ;;  %3124 = vmatpush1.bf16.msra.mxu1 %v4363_v42 }
 0x7cd   : > { %3084 = vmatprep.subr.bf16.mxu0 %v4368_v43  ;;  %3125 = vmatprep.subr.bf16.mxu1 %v4371_v44 }
 0x7d0   : > { %3085 = vmatpush1.bf16.msra.mxu0 %v4366_v45  ;;  %3126 = vmatpush1.bf16.msra.mxu1 %v4369_v47 }
 0x7d1   : > { %3086 = vmatprep.subr.bf16.mxu0 %v4374_v48  ;;  %3127 = vmatprep.subr.bf16.mxu1 %v4377_v49 }
 0x7d4   : > { %3087 = vmatpush1.bf16.msra.mxu0 %v4372_v50  ;;  %3128 = vmatpush1.bf16.msra.mxu1 %v4375_v51  ;;  %v2740_v51 = vld [vmem:[%s5598_s9] sm:$0x3] }
 0x7d5   : > { %3088 = vmatprep.subr.bf16.mxu0 %v4380_v52  ;;  %3129 = vmatprep.subr.bf16.mxu1 %v4383_v53  ;;  %v2745_v52 = vrot.slane %v2740_v51, %v5308_v8  ;;  %v2749_v53 = vrot.slane %v2740_v51, %v5315_v11 }
 0x7d8   : > { %3089 = vmatpush2.bf16.msra.mxu0 %v4378_v54  ;;  %3130 = vmatpush2.bf16.msra.mxu1 %v4381_v55 }
 0x7d9   : > { %3090 = vmatprep.subr.bf16.mxu0 %v4386_v56  ;;  %3131 = vmatprep.subr.bf16.mxu1 %v4389_v57 }
 0x7dc   : > { %3091 = vmatpush2.bf16.msra.mxu0 %v4384_v58  ;;  %3132 = vmatpush2.bf16.msra.mxu1 %v4387_v59 }
 0x7dd   : > { %3092 = vmatprep.subr.bf16.mxu0 %v4392_v3  ;;  %3133 = vmatprep.subr.bf16.mxu1 %v4395_v46 }
 0x7e0   : > { %3093 = vmatpush2.bf16.msra.mxu0 %v4390_v60  ;;  %3134 = vmatpush2.bf16.msra.mxu1 %v4393_v61 }
 0x7e1   : > { %3094 = vmatprep.subr.bf16.mxu0 %v4398_v62  ;;  %3135 = vmatprep.subr.bf16.mxu1 %v4401_v63 }
 0x7e4   : > { %3095 = vmatpush2.bf16.msra.mxu0 %v4396_v0  ;;  %3136 = vmatpush2.bf16.msra.mxu1 %v4399_v1 }
 0x7e5   : > { %3096 = vmatprep.subr.bf16.mxu0 %v4404_v34  ;;  %3137 = vmatprep.subr.bf16.mxu1 %v4407_v2 }
 0x7e8   : > { %3097 = vmatpush2.bf16.msra.mxu0 %v4402_v4  ;;  %3138 = vmatpush2.bf16.msra.mxu1 %v4405_v5 }
 0x7e9   : > { %3098 = vmatprep.subr.bf16.mxu0 %v4410_v6  ;;  %3139 = vmatprep.subr.bf16.mxu1 %v4413_v9 }
 0x7ec   : > { %3099 = vmatpush2.bf16.msra.mxu0 %v4408_v10  ;;  %3140 = vmatpush2.bf16.msra.mxu1 %v4411_v12 }
 0x7ed   : > { %3100 = vmatprep.subr.bf16.mxu0 %v4416_v13  ;;  %3141 = vmatprep.subr.bf16.mxu1 %v4419_v14 }
 0x7f0   : > { %3101 = vmatpush2.bf16.msra.mxu0 %v4414_v15  ;;  %3142 = vmatpush2.bf16.msra.mxu1 %v4417_v18 }
 0x7f1   : > { %3102 = vmatprep.subr.bf16.mxu0 %v4422_v19  ;;  %3143 = vmatprep.subr.bf16.mxu1 %v4425_v20 }
 0x7f4   : > { %3103 = vmatpush2.bf16.msra.mxu0 %v4420_v21  ;;  %3144 = vmatpush2.bf16.msra.mxu1 %v4423_v22 }
 0x877   : > { %v2620_v30 = vpop.f32.mrf.mxu0  ;;  %v2661_v31 = vpop.f32.mrf.mxu1 }
 0x878   : > { %v2621_v32 = vadd.f32 %v2620_v30, %v2249_v26  ;;  %v2662_v33 = vadd.f32 %v2661_v31, %v2257_v27 }
 0x879   : > { %v2622_v35 = vpop.f32.mrf.mxu0  ;;  %v2663_v36 = vpop.f32.mrf.mxu1 }
 0x87a   : > { %v2623_v37 = vadd.f32 %v2622_v35, %v2253_v28  ;;  %v2664_v38 = vadd.f32 %v2663_v36, %v2261_v29  ;;  %v2668_v39 = vmax.f32 %v2621_v32, 0.0  ;;  %v2670_v40 = vmax.f32 %v2662_v33, 0.0 }
 0x87b   : > { %v2624_v41 = vpop.f32.mrf.mxu0  ;;  %v2665_v42 = vpop.f32.mrf.mxu1 }
 0x87c   : > { %v2669_v43 = vmax.f32 %v2623_v37, 0.0  ;;  %v2671_v7 = vmax.f32 %v2664_v38, 0.0  ;;  %v2672_v49 = vpack.c.bf16 %v2668_v39, %v2668_v39  ;;  %v2674_v50 = vpack.c.bf16 %v2670_v40, %v2670_v40 }
 0x87d   : > { %v2625_v44 = vpop.f32.mrf.mxu0  ;;  %v2666_v45 = vpop.f32.mrf.mxu1 }
 0x87e   : > { %v2673_v47 = vpack.c.bf16 %v2669_v43, %v2669_v43  ;;  %v2675_v48 = vpack.c.bf16 %v2671_v7, %v2671_v7 }
 0x880   : > { %3104 = vmatprep.mubr.bf16.mxu0 %v2673_v47  ;;  %3145 = vmatprep.mubr.bf16.mxu1 %v2675_v48 }
 0x881   : > { %3105 = vmatmul.mubr.bf16.vlgmr.msra.gmra.mxu0 %v2672_v49  ;;  %3146 = vmatmul.mubr.bf16.vlgmr.msra.gmra.mxu1 %v2674_v50 }
 0x941   : > { %v3106_v54 = vpop.f32.mrf.mxu0  ;;  %v3147_v55 = vpop.f32.mrf.mxu1 }
 0x942   : > { %v3107_v56 = vadd.f32 %v3106_v54, %v2745_v52 }
 0x943   : > { %v3108_v57 = vpop.f32.mrf.mxu0  ;;  %v3149_v58 = vpop.f32.mrf.mxu1 }
 0x944   : > { %v3148_v59 = vadd.f32 %v3147_v55, %v3107_v56  ;;  %v3109_v3 = vadd.f32 %v3108_v57, %v2749_v53 }
 0x945   : > { %v3110_v46 = vpop.f32.mrf.mxu0  ;;  %v3151_v60 = vpop.f32.mrf.mxu1 }
 0x946   : > { %v3150_v61 = vadd.f32 %v3149_v58, %v3109_v3  ;;  %v3154_v0 = vadd.f32 %v3148_v59, %v5369_v17 }
 0x947   : > { %v3111_v62 = vpop.f32.mrf.mxu0  ;;  %v3152_v63 = vpop.f32.mrf.mxu1 }
 0x948   : > { %v3155_v1 = vadd.f32 %v3150_v61, %v5367_v16 }
 0x94a   : > { %v3158_v34 = vadd.f32 %v3155_v1, %v3154_v0 }
 0x94c   : > { %3159 = vadd.xlane.f32.xlu0 %v3158_v34 }
 0x9d5   : > { %v3160_v2 = vpop.xlane.xlu0 %3159 }
 0x9d6   : > { %v3161_v4 = vmul.f32 0.00390625, %v3160_v2 }
 0x9d8   : > { %v3162_v5 = vsub.f32 %v3154_v0, %v3161_v4  ;;  %v3163_v6 = vsub.f32 %v3155_v1, %v3161_v4 }
 0x9da   : > { %v3164_v9 = vmul.f32 %v3162_v5, %v3162_v5  ;;  %v3165_v10 = vmul.f32 %v3163_v6, %v3163_v6 }
 0x9dc   : > { %v3166_v12 = vadd.f32 %v3165_v10, %v3164_v9 }
 0x9de   : > { %3167 = vadd.xlane.f32.xlu1 %v3166_v12 }
 0x9df   : > { %4691 = shalt.err (!%p4688_p5)
}
 0x9e0   : > { %s4692_s26 = scalar_lea.hbm %s5396_s14, 128  ;;  %s4696_s21 = scalar_lea.hbm %s5600_s30, 512 }
 0x9e1   : > { %p4693_p9 = scmp.ne.s32.totalorder %s5396_s14, %s4692_s26  ;;  %p4697_p0 = scmp.lt.s32.totalorder %s5396_s14, %s5600_s30 }
 0x9e2   : > { %p4698_p2 = scmp.lt.s32.totalorder %s4696_s21, %s4692_s26 }
 0x9e3   : > { %p4694_p13 = pnand %p4693_p9, %p5176_p4 }
 0x9e4   : > { %p4699_p12 = por %p4698_p2, %p4697_p0 }
 0x9e5   : > { %p4695_p10 = pneg %p4694_p13 }
 0x9e7   : > { %p4700_p1 = pnand %p4699_p12, %p4695_p10 }
 0x9e9   : > { %4703 = shalt.err (!%p4700_p1)
}
 0x9ea   : > { %s4866_s25 = smov 64   ;;  %s4867_s1 = smov 128  }
 0x9eb   : > { %s4868_s17 = smov 4   ;;  %s5601_s7 = sld [smem:[#allocation55_spill]] }
 0x9ec   : > { %3879 = dma.vmem_to_hbm [thread:$0]  (%p5176_p4), %s5399_s13, 128, %s5396_s14, %s3208_s18, %s4866_s25, %s4867_s1, %s4868_s17  }
 0x9ed   : > { %s3773_s16 = sshll.u32 %s4832_s3, 1  ;;  %s5602_s29 = sld [smem:[#allocation56_spill]] }
 0x9ee   : > { %s3220_s14 = sadd.s32 %s3774_s19, %s3773_s16  ;;  %s3224_s13 = sshll.u32 %s5273_s20, 4  ;;  %s3225_s13 = int_to_ptr.vmem [resolvable:$true] %s3224_s13 }
 0x9ef   : > { %s3775_s3 = sshll.u32 %s3220_s14, 7  ;;  %s5603_s15 = sld [smem:[#allocation57_spill]] }
 0x9f0   : > { %s3203_s19 = scalar_lea.sflag [#allocation7], %s5234_s11  ;;  %s4704_s5 = scalar_lea.vmem %s3225_s13, 256 }
 0x9f1   : > { %v3156_v14 = vld [vmem:[%s5601_s7] sm:$0x3]  ;;  %p4705_p11 = scmp.ne.s32.totalorder %s3225_s13, %s4704_s5  ;;  %s4869_s9 = smov [#allocation20]  }
 0x9f2   : > { %v3178_v18 = vrot.slane %v3156_v14, %v5308_v8  ;;  %v3182_v19 = vrot.slane %v3156_v14, %v5315_v11  ;;  %s4708_s25 = sshll.u32 %s4869_s9, 4  ;;  %s4709_s25 = int_to_ptr.vmem [resolvable:$false] %s4708_s25 }
 0x9f3   : > { %v3157_v15 = vld [vmem:[%s5602_s29] sm:$0x3]  ;;  %p4706_p6 = pnand %p4705_p11, %p5176_p4  ;;  %s4710_s1 = scalar_lea.vmem %s4709_s25, 512 }
 0x9f4   : > { %v3191_v23 = vrot.slane %v3157_v15, %v5308_v8  ;;  %v3195_v24 = vrot.slane %v3157_v15, %v5315_v11  ;;  %p4711_p3 = scmp.lt.s32.totalorder %s3225_s13, %s4709_s25  ;;  %p4712_p5 = scmp.lt.s32.totalorder %s4710_s1, %s4704_s5 }
 0x9f5   : > { %s5441_s21 = scalar_lea.hbm %s5603_s15, %s3775_s3  ;;  %p4707_p7 = pneg %p4706_p6 }
 0x9f6   : > { %p4713_p9 = por %p4712_p5, %p4711_p3 }
 0x9f8   : > { %p4714_p13 = pnand %p4713_p9, %p4707_p7 }
 0xa67   : > { %v3168_v16 = vpop.xlane.xlu1 %3167 }
 0xa68   : > { %v3169_v17 = vmul.f32 0.00390625, %v3168_v16 }
 0xa6a   : > { %v3170_v13 = vadd.f32 1e-05, %v3169_v17 }
 0xa6c   : > { %4436 = vrsqrt.f32 %v3170_v13 }
 0xa79   : > { %v4437_v20 = vpop.eup %4436 }
 0xa7a   : > { %v3172_v21 = vmul.f32 %v4437_v20, %v3162_v5  ;;  %v3173_v22 = vmul.f32 %v4437_v20, %v3163_v6 }
 0xa7c   : > { %v3185_v25 = vmul.f32 %v3178_v18, %v3172_v21  ;;  %v3186_v26 = vmul.f32 %v3182_v19, %v3173_v22 }
 0xa7e   : > { %v3198_v27 = vadd.f32 %v3191_v23, %v3185_v25  ;;  %v3199_v28 = vadd.f32 %v3195_v24, %v3186_v26 }
 0xa80   : > { %3200 = vst [vmem:[%s5273_s20] sm:$0xff] %v3198_v27  ;;  %3201 = vst [vmem:[%s5273_s20 + $0x8] sm:$0xff] %v3199_v28 }
 0xa81   : > { %4717 = shalt.err (!%p4714_p13)
}
 0xa82   : > { %s4718_s20 = scalar_lea.hbm %s5441_s21, 256  ;;  %s4722_s12 = scalar_lea.hbm %s5603_s15, 1024 }
 0xa83   : > { %p4719_p10 = scmp.ne.s32.totalorder %s5441_s21, %s4718_s20  ;;  %p4723_p12 = scmp.lt.s32.totalorder %s5441_s21, %s5603_s15 }
 0xa84   : > { %p4724_p1 = scmp.lt.s32.totalorder %s4722_s12, %s4718_s20 }
 0xa85   : > { %p4720_p0 = pnand %p4719_p10, %p5176_p4 }
 0xa86   : > { %p4725_p11 = por %p4724_p1, %p4723_p12 }
 0xa87   : > { %p4721_p2 = pneg %p4720_p0 }
 0xa89   : > { %p4726_p6 = pnand %p4725_p11, %p4721_p2 }
 0xa8b   : > { %4729 = shalt.err (!%p4726_p6)
}
 0xa8c   : > { %3878 = dma.vmem_to_hbm [thread:$0]  (%p5176_p4), %s3225_s13, 256, %s5441_s21, %s3203_s19  }
 0xa8d PF: > { %p3931_p7 = scmp.ge.s32.totalorder %s4848_s4, 2  ;;  %s3253_s0 = sand.u32 1, %s4820_s24  }
 0xa8e   : > { %s3254_s26 = scalar_lea.sflag [#allocation7], %s3253_s0 }
 0xa8f   : > { %p3912_p3 = pnand %p3931_p7, %p5182_p8 }
 0xa91   : > { %p3913_p5 = pneg %p3912_p3 }
 0xa93   : > { %4799 = dma.done.wait (%p3913_p5), %s3254_s26, 256  }
 0xa94   : > { %4801 = vsyncadd (%p3913_p5), %s3254_s26, 4294967040  ;;  %s3263_s29 = scalar_lea.sflag [#allocation22], %s3253_s0 }
 0xa95   : > { %4803 = dma.done.wait (%p3913_p5), %s3263_s29, 128  }
 0xa96   : > { %4805 = vsyncadd (%p3913_p5), %s3263_s29, 4294967168  ;;  %s46_s4 = sadd.s32 1, %s4848_s4   ;;  %s5605_s10 = sld [smem:[#allocation36_spill]] }
 0xa97   : > { %p43_p9 = scmp.ge.s32.totalorder %s46_s4, 6   ;;  %s5606_s14 = sld [smem:[#allocation31_spill]] }
 0xa98   : > { %s5607_s25 = sld [smem:[#allocation37_spill]]  ;;  %s5610_s1 = smov %s4812_s22 }
 0xa99   : > { %s5608_s13 = sld [smem:[#allocation33_spill]]  ;;  %s5611_s22 = smov %s4816_s23 }
 0xa9a   : > { %s5609_s18 = sld [smem:[#allocation34_spill]]  ;;  %s5613_s24 = smov %s4824_s2 }
 0xa9b   : > { %s5615_s3 = smov %s4840_s27  ;;  %s5616_s26 = smov %s4844_s28 }
 0xa9c   : > { %s5612_s23 = smov %s5605_s10  ;;  %45 = sbr.rel (!%p43_p9) target bundleno = 38 (0x26), region = 212 }
 0xa9d   : > { %s5614_s2 = smov %s5606_s14 }
 0xa9f   : > { %s5617_s27 = smov %s5608_s13 }
 0xaa0   : > { %s5618_s28 = smov %s5609_s18 }
 0xaa1   :  { %3268 = vsyncpa [#allocation6], 1 }
 0xaa2   :  { %3270 = vsyncpa [#allocation6 + $0x1], 1 }
 0xaa3   :  { %3271 = vsyncpa [#allocation9], 1 }
 0xaa4   :  { %3273 = vsyncpa [#allocation9 + $0x1], 1 }
 0xaa5   :  { %3274 = vsyncpa [#allocation12], 1 }
 0xaa6   :  { %3275 = vsyncpa [#allocation15], 1 }
 0xaa7   :  { %3276 = vsyncpa [#allocation18], 1 }
 0xaa8   :  { %3277 = vsyncpa [#allocation7], 1 }
 0xaa9   :  { %3279 = vsyncpa [#allocation7 + $0x1], 1 }
 0xaaa   :  { %3280 = vsyncpa [#allocation22], 1 }
 0xaab   :  { %3282 = vsyncpa [#allocation22 + $0x1], 1 }

</bundles_post_ra>
